<compile_context>
chip_gen: v7x
topology: tpu7x:2x2x1
jax: 0.10.0
libtpu: 0.0.40
codegen_flags: <defaults>
</compile_context>

<pallas_src>
import jax
import jax.numpy as jnp
from jax import lax
from jax.experimental import pallas as pl
from jax.experimental.pallas import tpu as pltpu
import numpy as np

EMBEDDING_SIZE = 64
HIDDEN_SIZE = 32
NUM_QUESTIONS = 1774
OUT_SHAPE = 1
SUBLANES = 8  # pad the batch to one sublane group


def question_kernel(idx_ref, emb_hbm, w_ih_t_ref, w_hh_t_ref, b_ref,
                    w_fc_ref, b_fc_ref, out_ref, x_scr, gather_sem):
    """Fused HBM-gather + LSTM + masked batch-mean + FC + tanh.

    idx_ref:    SMEM (T*B,)        int32 question ids (t-major, b-minor)
    emb_hbm:    HBM  (NQ, E)       embedding table (never copied wholesale)
    w_ih_t_ref: VMEM (E, 4H)       pre-transposed, gate rows (i,f,o,g)
    w_hh_t_ref: VMEM (H, 4H)       pre-transposed, gate rows (i,f,o,g)
    b_ref:      VMEM (1, 4H)       bias_ih + bias_hh, reordered (i,f,o,g)
    w_fc_ref:   VMEM (1, H)        fc.weight row
    b_fc_ref:   VMEM (1, 1)        fc.bias
    out_ref:    VMEM (T, 1)
    x_scr:      VMEM (T*Bpad, E)   gathered embeddings (padded rows unused)
    gather_sem: DMA sems (T*B,)
    """
    T = out_ref.shape[0]
    H = HIDDEN_SIZE
    TBP, E = x_scr.shape
    b_pad = TBP // T
    TB = idx_ref.shape[0]
    B = TB // T

    # ---- embedding gather straight from HBM: start all row DMAs, wait once.
    copies = []
    for r in range(TB):
        t, b = divmod(r, B)
        cp = pltpu.make_async_copy(
            emb_hbm.at[pl.ds(idx_ref[r], 1), :],
            x_scr.at[pl.ds(t * b_pad + b, 1), :],
            gather_sem.at[r])
        cp.start()
        copies.append(cp)
    for cp in copies:
        cp.wait()

    # ---- hoisted input projection: ONE (T*Bpad, E) x (E, 4H) matmul + bias.
    gates_x = (jnp.dot(x_scr[...], w_ih_t_ref[...],
                       preferred_element_type=jnp.float32)
               + b_ref[...])                                   # (T*Bpad, 4H)

    w_hh_t = w_hh_t_ref[...]                                   # (H, 4H)
    inv_b = jnp.float32(1.0 / B)
    # Padded rows of x_scr are never written; all per-row ops keep their
    # garbage confined to those rows, and this select keeps them out of the
    # batch mean (select, not multiply, so even NaN garbage cannot leak).
    row_ids = lax.broadcasted_iota(jnp.int32, (b_pad, 1), 0)
    row_mask = row_ids < B

    # ---- serial recurrence; h/c and per-step means carried in registers.
    # TODO(synk): for larger T switch to lax.fori_loop(..., unroll=k); also
    # worth measuring pltpu.matmul_push_rhs (resident W_hh) vs this per-step
    # jnp.dot for the recurrence.
    h = jnp.zeros((b_pad, H), jnp.float32)
    c = jnp.zeros((b_pad, H), jnp.float32)
    means = []
    for t in range(T):
        gates = gates_x[t * b_pad:(t + 1) * b_pad, :] + jnp.dot(
            h, w_hh_t, preferred_element_type=jnp.float32)     # (Bpad, 4H)
        # gate layout after reorder: [i | f | o | g]
        # sigmoid(x) = 0.5*tanh(0.5*x) + 0.5 : one EUP push instead of two.
        sig = 0.5 * jnp.tanh(0.5 * gates[:, 0:3 * H]) + 0.5
        g_g = jnp.tanh(gates[:, 3 * H:4 * H])
        i_g = sig[:, 0:H]
        f_g = sig[:, H:2 * H]
        o_g = sig[:, 2 * H:3 * H]
        c = f_g * c + i_g * g_g
        h = o_g * jnp.tanh(c)
        # mean over dim=1 (batch) of the real rows only, kept in registers.
        means.append(
            jnp.sum(jnp.where(row_mask, h, 0.0), axis=0, keepdims=True) * inv_b)

    mean_mat = jnp.concatenate(means, axis=0)                  # (T, H)

    # ---- final FC on the VPU (N=1 output column: multiply + lane reduce).
    # TODO(synk): if many sequences are batched per call, make this output
    # lane-dense (last dim multiple of 128) instead of (T, 1).
    fc = (jnp.sum(mean_mat * w_fc_ref[...], axis=-1, keepdims=True)
          + b_fc_ref[...])                                     # (T, 1)
    out_ref[...] = jnp.tanh(fc)


def question_embeddings_forward(indices, params):
    """indices: (T, B) int32 in [0, NUM_QUESTIONS)."""
    T, B = indices.shape
    H = HIDDEN_SIZE
    E = EMBEDDING_SIZE
    b_pad = ((B + SUBLANES - 1) // SUBLANES) * SUBLANES

    # PyTorch LSTM gate-row order is (i, f, g, o); permute rows to (i, f, o, g)
    # so one sigmoid covers lanes 0:3H and one tanh covers 3H:4H in the kernel.
    def reorder_rows(w):
        return jnp.concatenate(
            [w[0:H], w[H:2 * H], w[3 * H:4 * H], w[2 * H:3 * H]], axis=0)

    w_ih_t = reorder_rows(params["w_ih"]).T                    # (E, 4H)
    w_hh_t = reorder_rows(params["w_hh"]).T                    # (H, 4H)
    bias = params["b_ih"] + params["b_hh"]                     # (4H,)
    bias = jnp.concatenate(
        [bias[0:H], bias[H:2 * H], bias[3 * H:4 * H], bias[2 * H:3 * H]]
    ).reshape(1, 4 * H)
    w_fc_row = params["w_fc"].reshape(1, H)
    b_fc = params["b_fc"].reshape(1, 1)
    idx_flat = indices.reshape(T * B).astype(jnp.int32)

    # TODO(synk): with many independent sequences per call, add a leading
    # "parallel" grid axis so both v7x TensorCores are used.
    out = pl.pallas_call(
        question_kernel,
        out_shape=jax.ShapeDtypeStruct((T, OUT_SHAPE), jnp.float32),
        in_specs=[
            pl.BlockSpec(memory_space=pltpu.MemorySpace.SMEM),   # indices
            pl.BlockSpec(memory_space=pl.ANY),                   # emb table (HBM)
            pl.BlockSpec(memory_space=pltpu.MemorySpace.VMEM),   # w_ih_t
            pl.BlockSpec(memory_space=pltpu.MemorySpace.VMEM),   # w_hh_t
            pl.BlockSpec(memory_space=pltpu.MemorySpace.VMEM),   # bias
            pl.BlockSpec(memory_space=pltpu.MemorySpace.VMEM),   # w_fc
            pl.BlockSpec(memory_space=pltpu.MemorySpace.VMEM),   # b_fc
        ],
        out_specs=pl.BlockSpec(memory_space=pltpu.MemorySpace.VMEM),
        scratch_shapes=[
            pltpu.VMEM((T * b_pad, E), jnp.float32),   # gathered embeddings
            pltpu.SemaphoreType.DMA((T * B,)),         # one sem per row DMA
        ],
    )(idx_flat, params["embedding"], w_ih_t, w_hh_t, bias, w_fc_row, b_fc)
    return out


def reference_forward(indices, params):
    """Pure-JAX reference matching PyTorch semantics (gate order i,f,g,o)."""
    x = jnp.take(params["embedding"], indices, axis=0)          # (T, B, E)
    T, B, _ = x.shape
    H = HIDDEN_SIZE
    h = jnp.zeros((B, H), jnp.float32)
    c = jnp.zeros((B, H), jnp.float32)
    bias = params["b_ih"] + params["b_hh"]
    outs = []
    for t in range(T):
        gates = x[t] @ params["w_ih"].T + h @ params["w_hh"].T + bias
        i_g = jax.nn.sigmoid(gates[:, 0:H])
        f_g = jax.nn.sigmoid(gates[:, H:2 * H])
        g_g = jnp.tanh(gates[:, 2 * H:3 * H])
        o_g = jax.nn.sigmoid(gates[:, 3 * H:4 * H])
        c = f_g * c + i_g * g_g
        h = o_g * jnp.tanh(c)
        outs.append(h)
    lstm_out = jnp.stack(outs)               # (T, B, H)
    mean_out = lstm_out.mean(axis=1)         # (T, H)
    return jnp.tanh(mean_out @ params["w_fc"].T + params["b_fc"])


if __name__ == "__main__":
    key = jax.random.PRNGKey(0)
    ks = jax.random.split(key, 8)
    params = {
        "embedding": 0.1 * jax.random.normal(ks[0], (NUM_QUESTIONS, EMBEDDING_SIZE), jnp.float32),
        "w_ih":      0.1 * jax.random.normal(ks[1], (4 * HIDDEN_SIZE, EMBEDDING_SIZE), jnp.float32),
        "w_hh":      0.1 * jax.random.normal(ks[2], (4 * HIDDEN_SIZE, HIDDEN_SIZE), jnp.float32),
        "b_ih":      0.1 * jax.random.normal(ks[3], (4 * HIDDEN_SIZE,), jnp.float32),
        "b_hh":      0.1 * jax.random.normal(ks[4], (4 * HIDDEN_SIZE,), jnp.float32),
        "w_fc":      0.1 * jax.random.normal(ks[5], (OUT_SHAPE, HIDDEN_SIZE), jnp.float32),
        "b_fc":      0.1 * jax.random.normal(ks[6], (OUT_SHAPE,), jnp.float32),
    }

    T, B = 8, 2
    indices = jax.random.randint(ks[7], (T, B), 0, NUM_QUESTIONS, dtype=jnp.int32)

    out = question_embeddings_forward(indices, params)
    out = jax.block_until_ready(out)

    ref = reference_forward(indices, params)
    assert out.shape == (T, OUT_SHAPE), out.shape
    assert np.allclose(np.asarray(out), np.asarray(ref), atol=1e-5, rtol=1e-5)
    print("KERNEL_OK")
</pallas_src>

<mosaic_0001>
module attributes {stable_mosaic.version = 11 : i64} {
  func.func @question_kernel(%arg0: memref<16xi32, #tpu.memory_space<smem>>, %arg1: memref<1774x64xf32, #tpu.memory_space<any>>, %arg2: memref<64x128xf32, #tpu.memory_space<vmem>>, %arg3: memref<32x128xf32, #tpu.memory_space<vmem>>, %arg4: memref<1x128xf32, #tpu.memory_space<vmem>>, %arg5: memref<1x32xf32, #tpu.memory_space<vmem>>, %arg6: memref<1x1xf32, #tpu.memory_space<vmem>>, %arg7: memref<8x1xf32, #tpu.memory_space<vmem>>, %arg8: memref<64x64xf32, #tpu.memory_space<vmem>>, %arg9: memref<16x!tpu.dma_semaphore, #tpu.memory_space<semaphore_mem>>) attributes {dimension_semantics = [], scalar_prefetch = 0 : i64, scratch_operands = 2 : i64, tpu.core_type = #tpu.core_type<tc>} {
    %c0 = arith.constant 0 : index
    %0 = memref.load %arg0[%c0] : memref<16xi32, #tpu.memory_space<smem>>
    %c0_i32 = arith.constant 0 : i32
    %c0_i32_0 = arith.constant 0 : i32
    %1 = tpu.memref_slice %arg1[%0, %c0_i32_0] : memref<1774x64xf32, #tpu.memory_space<any>> -> memref<1x64xf32, #tpu.memory_space<any>>
    %c0_i32_1 = arith.constant 0 : i32
    %c0_i32_2 = arith.constant 0 : i32
    %2 = tpu.memref_slice %arg8[%c0_i32_1, %c0_i32_2] : memref<64x64xf32, #tpu.memory_space<vmem>> -> memref<1x64xf32, #tpu.memory_space<vmem>>
    %3 = tpu.memref_slice %arg9[%c0_i32] : memref<16x!tpu.dma_semaphore, #tpu.memory_space<semaphore_mem>> -> memref<1x!tpu.dma_semaphore, #tpu.memory_space<semaphore_mem>>
    %4 = tpu.memref_squeeze %3 : memref<1x!tpu.dma_semaphore, #tpu.memory_space<semaphore_mem>> -> memref<!tpu.dma_semaphore, #tpu.memory_space<semaphore_mem>>
    tpu.enqueue_dma source(%1 : memref<1x64xf32, #tpu.memory_space<any>>) target(%2 : memref<1x64xf32, #tpu.memory_space<vmem>>) target_semaphore(%4 : memref<!tpu.dma_semaphore, #tpu.memory_space<semaphore_mem>>)
    %c1 = arith.constant 1 : index
    %5 = memref.load %arg0[%c1] : memref<16xi32, #tpu.memory_space<smem>>
    %c1_i32 = arith.constant 1 : i32
    %c0_i32_3 = arith.constant 0 : i32
    %6 = tpu.memref_slice %arg1[%5, %c0_i32_3] : memref<1774x64xf32, #tpu.memory_space<any>> -> memref<1x64xf32, #tpu.memory_space<any>>
    %c1_i32_4 = arith.constant 1 : i32
    %c0_i32_5 = arith.constant 0 : i32
    %7 = tpu.memref_slice %arg8[%c1_i32_4, %c0_i32_5] : memref<64x64xf32, #tpu.memory_space<vmem>> -> memref<1x64xf32, #tpu.memory_space<vmem>>
    %8 = tpu.memref_slice %arg9[%c1_i32] : memref<16x!tpu.dma_semaphore, #tpu.memory_space<semaphore_mem>> -> memref<1x!tpu.dma_semaphore, #tpu.memory_space<semaphore_mem>>
    %9 = tpu.memref_squeeze %8 : memref<1x!tpu.dma_semaphore, #tpu.memory_space<semaphore_mem>> -> memref<!tpu.dma_semaphore, #tpu.memory_space<semaphore_mem>>
    tpu.enqueue_dma source(%6 : memref<1x64xf32, #tpu.memory_space<any>>) target(%7 : memref<1x64xf32, #tpu.memory_space<vmem>>) target_semaphore(%9 : memref<!tpu.dma_semaphore, #tpu.memory_space<semaphore_mem>>)
    %c2 = arith.constant 2 : index
    %10 = memref.load %arg0[%c2] : memref<16xi32, #tpu.memory_space<smem>>
    %c2_i32 = arith.constant 2 : i32
    %c0_i32_6 = arith.constant 0 : i32
    %11 = tpu.memref_slice %arg1[%10, %c0_i32_6] : memref<1774x64xf32, #tpu.memory_space<any>> -> memref<1x64xf32, #tpu.memory_space<any>>
    %c8_i32 = arith.constant 8 : i32
    %c0_i32_7 = arith.constant 0 : i32
    %12 = tpu.memref_slice %arg8[%c8_i32, %c0_i32_7] : memref<64x64xf32, #tpu.memory_space<vmem>> -> memref<1x64xf32, #tpu.memory_space<vmem>>
    %13 = tpu.memref_slice %arg9[%c2_i32] : memref<16x!tpu.dma_semaphore, #tpu.memory_space<semaphore_mem>> -> memref<1x!tpu.dma_semaphore, #tpu.memory_space<semaphore_mem>>
    %14 = tpu.memref_squeeze %13 : memref<1x!tpu.dma_semaphore, #tpu.memory_space<semaphore_mem>> -> memref<!tpu.dma_semaphore, #tpu.memory_space<semaphore_mem>>
    tpu.enqueue_dma source(%11 : memref<1x64xf32, #tpu.memory_space<any>>) target(%12 : memref<1x64xf32, #tpu.memory_space<vmem>>) target_semaphore(%14 : memref<!tpu.dma_semaphore, #tpu.memory_space<semaphore_mem>>)
    %c3 = arith.constant 3 : index
    %15 = memref.load %arg0[%c3] : memref<16xi32, #tpu.memory_space<smem>>
    %c3_i32 = arith.constant 3 : i32
    %c0_i32_8 = arith.constant 0 : i32
    %16 = tpu.memref_slice %arg1[%15, %c0_i32_8] : memref<1774x64xf32, #tpu.memory_space<any>> -> memref<1x64xf32, #tpu.memory_space<any>>
    %c9_i32 = arith.constant 9 : i32
    %c0_i32_9 = arith.constant 0 : i32
    %17 = tpu.memref_slice %arg8[%c9_i32, %c0_i32_9] : memref<64x64xf32, #tpu.memory_space<vmem>> -> memref<1x64xf32, #tpu.memory_space<vmem>>
    %18 = tpu.memref_slice %arg9[%c3_i32] : memref<16x!tpu.dma_semaphore, #tpu.memory_space<semaphore_mem>> -> memref<1x!tpu.dma_semaphore, #tpu.memory_space<semaphore_mem>>
    %19 = tpu.memref_squeeze %18 : memref<1x!tpu.dma_semaphore, #tpu.memory_space<semaphore_mem>> -> memref<!tpu.dma_semaphore, #tpu.memory_space<semaphore_mem>>
    tpu.enqueue_dma source(%16 : memref<1x64xf32, #tpu.memory_space<any>>) target(%17 : memref<1x64xf32, #tpu.memory_space<vmem>>) target_semaphore(%19 : memref<!tpu.dma_semaphore, #tpu.memory_space<semaphore_mem>>)
    %c4 = arith.constant 4 : index
    %20 = memref.load %arg0[%c4] : memref<16xi32, #tpu.memory_space<smem>>
    %c4_i32 = arith.constant 4 : i32
    %c0_i32_10 = arith.constant 0 : i32
    %21 = tpu.memref_slice %arg1[%20, %c0_i32_10] : memref<1774x64xf32, #tpu.memory_space<any>> -> memref<1x64xf32, #tpu.memory_space<any>>
    %c16_i32 = arith.constant 16 : i32
    %c0_i32_11 = arith.constant 0 : i32
    %22 = tpu.memref_slice %arg8[%c16_i32, %c0_i32_11] : memref<64x64xf32, #tpu.memory_space<vmem>> -> memref<1x64xf32, #tpu.memory_space<vmem>>
    %23 = tpu.memref_slice %arg9[%c4_i32] : memref<16x!tpu.dma_semaphore, #tpu.memory_space<semaphore_mem>> -> memref<1x!tpu.dma_semaphore, #tpu.memory_space<semaphore_mem>>
    %24 = tpu.memref_squeeze %23 : memref<1x!tpu.dma_semaphore, #tpu.memory_space<semaphore_mem>> -> memref<!tpu.dma_semaphore, #tpu.memory_space<semaphore_mem>>
    tpu.enqueue_dma source(%21 : memref<1x64xf32, #tpu.memory_space<any>>) target(%22 : memref<1x64xf32, #tpu.memory_space<vmem>>) target_semaphore(%24 : memref<!tpu.dma_semaphore, #tpu.memory_space<semaphore_mem>>)
    %c5 = arith.constant 5 : index
    %25 = memref.load %arg0[%c5] : memref<16xi32, #tpu.memory_space<smem>>
    %c5_i32 = arith.constant 5 : i32
    %c0_i32_12 = arith.constant 0 : i32
    %26 = tpu.memref_slice %arg1[%25, %c0_i32_12] : memref<1774x64xf32, #tpu.memory_space<any>> -> memref<1x64xf32, #tpu.memory_space<any>>
    %c17_i32 = arith.constant 17 : i32
    %c0_i32_13 = arith.constant 0 : i32
    %27 = tpu.memref_slice %arg8[%c17_i32, %c0_i32_13] : memref<64x64xf32, #tpu.memory_space<vmem>> -> memref<1x64xf32, #tpu.memory_space<vmem>>
    %28 = tpu.memref_slice %arg9[%c5_i32] : memref<16x!tpu.dma_semaphore, #tpu.memory_space<semaphore_mem>> -> memref<1x!tpu.dma_semaphore, #tpu.memory_space<semaphore_mem>>
    %29 = tpu.memref_squeeze %28 : memref<1x!tpu.dma_semaphore, #tpu.memory_space<semaphore_mem>> -> memref<!tpu.dma_semaphore, #tpu.memory_space<semaphore_mem>>
    tpu.enqueue_dma source(%26 : memref<1x64xf32, #tpu.memory_space<any>>) target(%27 : memref<1x64xf32, #tpu.memory_space<vmem>>) target_semaphore(%29 : memref<!tpu.dma_semaphore, #tpu.memory_space<semaphore_mem>>)
    %c6 = arith.constant 6 : index
    %30 = memref.load %arg0[%c6] : memref<16xi32, #tpu.memory_space<smem>>
    %c6_i32 = arith.constant 6 : i32
    %c0_i32_14 = arith.constant 0 : i32
    %31 = tpu.memref_slice %arg1[%30, %c0_i32_14] : memref<1774x64xf32, #tpu.memory_space<any>> -> memref<1x64xf32, #tpu.memory_space<any>>
    %c24_i32 = arith.constant 24 : i32
    %c0_i32_15 = arith.constant 0 : i32
    %32 = tpu.memref_slice %arg8[%c24_i32, %c0_i32_15] : memref<64x64xf32, #tpu.memory_space<vmem>> -> memref<1x64xf32, #tpu.memory_space<vmem>>
    %33 = tpu.memref_slice %arg9[%c6_i32] : memref<16x!tpu.dma_semaphore, #tpu.memory_space<semaphore_mem>> -> memref<1x!tpu.dma_semaphore, #tpu.memory_space<semaphore_mem>>
    %34 = tpu.memref_squeeze %33 : memref<1x!tpu.dma_semaphore, #tpu.memory_space<semaphore_mem>> -> memref<!tpu.dma_semaphore, #tpu.memory_space<semaphore_mem>>
    tpu.enqueue_dma source(%31 : memref<1x64xf32, #tpu.memory_space<any>>) target(%32 : memref<1x64xf32, #tpu.memory_space<vmem>>) target_semaphore(%34 : memref<!tpu.dma_semaphore, #tpu.memory_space<semaphore_mem>>)
    %c7 = arith.constant 7 : index
    %35 = memref.load %arg0[%c7] : memref<16xi32, #tpu.memory_space<smem>>
    %c7_i32 = arith.constant 7 : i32
    %c0_i32_16 = arith.constant 0 : i32
    %36 = tpu.memref_slice %arg1[%35, %c0_i32_16] : memref<1774x64xf32, #tpu.memory_space<any>> -> memref<1x64xf32, #tpu.memory_space<any>>
    %c25_i32 = arith.constant 25 : i32
    %c0_i32_17 = arith.constant 0 : i32
    %37 = tpu.memref_slice %arg8[%c25_i32, %c0_i32_17] : memref<64x64xf32, #tpu.memory_space<vmem>> -> memref<1x64xf32, #tpu.memory_space<vmem>>
    %38 = tpu.memref_slice %arg9[%c7_i32] : memref<16x!tpu.dma_semaphore, #tpu.memory_space<semaphore_mem>> -> memref<1x!tpu.dma_semaphore, #tpu.memory_space<semaphore_mem>>
    %39 = tpu.memref_squeeze %38 : memref<1x!tpu.dma_semaphore, #tpu.memory_space<semaphore_mem>> -> memref<!tpu.dma_semaphore, #tpu.memory_space<semaphore_mem>>
    tpu.enqueue_dma source(%36 : memref<1x64xf32, #tpu.memory_space<any>>) target(%37 : memref<1x64xf32, #tpu.memory_space<vmem>>) target_semaphore(%39 : memref<!tpu.dma_semaphore, #tpu.memory_space<semaphore_mem>>)
    %c8 = arith.constant 8 : index
    %40 = memref.load %arg0[%c8] : memref<16xi32, #tpu.memory_space<smem>>
    %c8_i32_18 = arith.constant 8 : i32
    %c0_i32_19 = arith.constant 0 : i32
    %41 = tpu.memref_slice %arg1[%40, %c0_i32_19] : memref<1774x64xf32, #tpu.memory_space<any>> -> memref<1x64xf32, #tpu.memory_space<any>>
    %c32_i32 = arith.constant 32 : i32
    %c0_i32_20 = arith.constant 0 : i32
    %42 = tpu.memref_slice %arg8[%c32_i32, %c0_i32_20] : memref<64x64xf32, #tpu.memory_space<vmem>> -> memref<1x64xf32, #tpu.memory_space<vmem>>
    %43 = tpu.memref_slice %arg9[%c8_i32_18] : memref<16x!tpu.dma_semaphore, #tpu.memory_space<semaphore_mem>> -> memref<1x!tpu.dma_semaphore, #tpu.memory_space<semaphore_mem>>
    %44 = tpu.memref_squeeze %43 : memref<1x!tpu.dma_semaphore, #tpu.memory_space<semaphore_mem>> -> memref<!tpu.dma_semaphore, #tpu.memory_space<semaphore_mem>>
    tpu.enqueue_dma source(%41 : memref<1x64xf32, #tpu.memory_space<any>>) target(%42 : memref<1x64xf32, #tpu.memory_space<vmem>>) target_semaphore(%44 : memref<!tpu.dma_semaphore, #tpu.memory_space<semaphore_mem>>)
    %c9 = arith.constant 9 : index
    %45 = memref.load %arg0[%c9] : memref<16xi32, #tpu.memory_space<smem>>
    %c9_i32_21 = arith.constant 9 : i32
    %c0_i32_22 = arith.constant 0 : i32
    %46 = tpu.memref_slice %arg1[%45, %c0_i32_22] : memref<1774x64xf32, #tpu.memory_space<any>> -> memref<1x64xf32, #tpu.memory_space<any>>
    %c33_i32 = arith.constant 33 : i32
    %c0_i32_23 = arith.constant 0 : i32
    %47 = tpu.memref_slice %arg8[%c33_i32, %c0_i32_23] : memref<64x64xf32, #tpu.memory_space<vmem>> -> memref<1x64xf32, #tpu.memory_space<vmem>>
    %48 = tpu.memref_slice %arg9[%c9_i32_21] : memref<16x!tpu.dma_semaphore, #tpu.memory_space<semaphore_mem>> -> memref<1x!tpu.dma_semaphore, #tpu.memory_space<semaphore_mem>>
    %49 = tpu.memref_squeeze %48 : memref<1x!tpu.dma_semaphore, #tpu.memory_space<semaphore_mem>> -> memref<!tpu.dma_semaphore, #tpu.memory_space<semaphore_mem>>
    tpu.enqueue_dma source(%46 : memref<1x64xf32, #tpu.memory_space<any>>) target(%47 : memref<1x64xf32, #tpu.memory_space<vmem>>) target_semaphore(%49 : memref<!tpu.dma_semaphore, #tpu.memory_space<semaphore_mem>>)
    %c10 = arith.constant 10 : index
    %50 = memref.load %arg0[%c10] : memref<16xi32, #tpu.memory_space<smem>>
    %c10_i32 = arith.constant 10 : i32
    %c0_i32_24 = arith.constant 0 : i32
    %51 = tpu.memref_slice %arg1[%50, %c0_i32_24] : memref<1774x64xf32, #tpu.memory_space<any>> -> memref<1x64xf32, #tpu.memory_space<any>>
    %c40_i32 = arith.constant 40 : i32
    %c0_i32_25 = arith.constant 0 : i32
    %52 = tpu.memref_slice %arg8[%c40_i32, %c0_i32_25] : memref<64x64xf32, #tpu.memory_space<vmem>> -> memref<1x64xf32, #tpu.memory_space<vmem>>
    %53 = tpu.memref_slice %arg9[%c10_i32] : memref<16x!tpu.dma_semaphore, #tpu.memory_space<semaphore_mem>> -> memref<1x!tpu.dma_semaphore, #tpu.memory_space<semaphore_mem>>
    %54 = tpu.memref_squeeze %53 : memref<1x!tpu.dma_semaphore, #tpu.memory_space<semaphore_mem>> -> memref<!tpu.dma_semaphore, #tpu.memory_space<semaphore_mem>>
    tpu.enqueue_dma source(%51 : memref<1x64xf32, #tpu.memory_space<any>>) target(%52 : memref<1x64xf32, #tpu.memory_space<vmem>>) target_semaphore(%54 : memref<!tpu.dma_semaphore, #tpu.memory_space<semaphore_mem>>)
    %c11 = arith.constant 11 : index
    %55 = memref.load %arg0[%c11] : memref<16xi32, #tpu.memory_space<smem>>
    %c11_i32 = arith.constant 11 : i32
    %c0_i32_26 = arith.constant 0 : i32
    %56 = tpu.memref_slice %arg1[%55, %c0_i32_26] : memref<1774x64xf32, #tpu.memory_space<any>> -> memref<1x64xf32, #tpu.memory_space<any>>
    %c41_i32 = arith.constant 41 : i32
    %c0_i32_27 = arith.constant 0 : i32
    %57 = tpu.memref_slice %arg8[%c41_i32, %c0_i32_27] : memref<64x64xf32, #tpu.memory_space<vmem>> -> memref<1x64xf32, #tpu.memory_space<vmem>>
    %58 = tpu.memref_slice %arg9[%c11_i32] : memref<16x!tpu.dma_semaphore, #tpu.memory_space<semaphore_mem>> -> memref<1x!tpu.dma_semaphore, #tpu.memory_space<semaphore_mem>>
    %59 = tpu.memref_squeeze %58 : memref<1x!tpu.dma_semaphore, #tpu.memory_space<semaphore_mem>> -> memref<!tpu.dma_semaphore, #tpu.memory_space<semaphore_mem>>
    tpu.enqueue_dma source(%56 : memref<1x64xf32, #tpu.memory_space<any>>) target(%57 : memref<1x64xf32, #tpu.memory_space<vmem>>) target_semaphore(%59 : memref<!tpu.dma_semaphore, #tpu.memory_space<semaphore_mem>>)
    %c12 = arith.constant 12 : index
    %60 = memref.load %arg0[%c12] : memref<16xi32, #tpu.memory_space<smem>>
    %c12_i32 = arith.constant 12 : i32
    %c0_i32_28 = arith.constant 0 : i32
    %61 = tpu.memref_slice %arg1[%60, %c0_i32_28] : memref<1774x64xf32, #tpu.memory_space<any>> -> memref<1x64xf32, #tpu.memory_space<any>>
    %c48_i32 = arith.constant 48 : i32
    %c0_i32_29 = arith.constant 0 : i32
    %62 = tpu.memref_slice %arg8[%c48_i32, %c0_i32_29] : memref<64x64xf32, #tpu.memory_space<vmem>> -> memref<1x64xf32, #tpu.memory_space<vmem>>
    %63 = tpu.memref_slice %arg9[%c12_i32] : memref<16x!tpu.dma_semaphore, #tpu.memory_space<semaphore_mem>> -> memref<1x!tpu.dma_semaphore, #tpu.memory_space<semaphore_mem>>
    %64 = tpu.memref_squeeze %63 : memref<1x!tpu.dma_semaphore, #tpu.memory_space<semaphore_mem>> -> memref<!tpu.dma_semaphore, #tpu.memory_space<semaphore_mem>>
    tpu.enqueue_dma source(%61 : memref<1x64xf32, #tpu.memory_space<any>>) target(%62 : memref<1x64xf32, #tpu.memory_space<vmem>>) target_semaphore(%64 : memref<!tpu.dma_semaphore, #tpu.memory_space<semaphore_mem>>)
    %c13 = arith.constant 13 : index
    %65 = memref.load %arg0[%c13] : memref<16xi32, #tpu.memory_space<smem>>
    %c13_i32 = arith.constant 13 : i32
    %c0_i32_30 = arith.constant 0 : i32
    %66 = tpu.memref_slice %arg1[%65, %c0_i32_30] : memref<1774x64xf32, #tpu.memory_space<any>> -> memref<1x64xf32, #tpu.memory_space<any>>
    %c49_i32 = arith.constant 49 : i32
    %c0_i32_31 = arith.constant 0 : i32
    %67 = tpu.memref_slice %arg8[%c49_i32, %c0_i32_31] : memref<64x64xf32, #tpu.memory_space<vmem>> -> memref<1x64xf32, #tpu.memory_space<vmem>>
    %68 = tpu.memref_slice %arg9[%c13_i32] : memref<16x!tpu.dma_semaphore, #tpu.memory_space<semaphore_mem>> -> memref<1x!tpu.dma_semaphore, #tpu.memory_space<semaphore_mem>>
    %69 = tpu.memref_squeeze %68 : memref<1x!tpu.dma_semaphore, #tpu.memory_space<semaphore_mem>> -> memref<!tpu.dma_semaphore, #tpu.memory_space<semaphore_mem>>
    tpu.enqueue_dma source(%66 : memref<1x64xf32, #tpu.memory_space<any>>) target(%67 : memref<1x64xf32, #tpu.memory_space<vmem>>) target_semaphore(%69 : memref<!tpu.dma_semaphore, #tpu.memory_space<semaphore_mem>>)
    %c14 = arith.constant 14 : index
    %70 = memref.load %arg0[%c14] : memref<16xi32, #tpu.memory_space<smem>>
    %c14_i32 = arith.constant 14 : i32
    %c0_i32_32 = arith.constant 0 : i32
    %71 = tpu.memref_slice %arg1[%70, %c0_i32_32] : memref<1774x64xf32, #tpu.memory_space<any>> -> memref<1x64xf32, #tpu.memory_space<any>>
    %c56_i32 = arith.constant 56 : i32
    %c0_i32_33 = arith.constant 0 : i32
    %72 = tpu.memref_slice %arg8[%c56_i32, %c0_i32_33] : memref<64x64xf32, #tpu.memory_space<vmem>> -> memref<1x64xf32, #tpu.memory_space<vmem>>
    %73 = tpu.memref_slice %arg9[%c14_i32] : memref<16x!tpu.dma_semaphore, #tpu.memory_space<semaphore_mem>> -> memref<1x!tpu.dma_semaphore, #tpu.memory_space<semaphore_mem>>
    %74 = tpu.memref_squeeze %73 : memref<1x!tpu.dma_semaphore, #tpu.memory_space<semaphore_mem>> -> memref<!tpu.dma_semaphore, #tpu.memory_space<semaphore_mem>>
    tpu.enqueue_dma source(%71 : memref<1x64xf32, #tpu.memory_space<any>>) target(%72 : memref<1x64xf32, #tpu.memory_space<vmem>>) target_semaphore(%74 : memref<!tpu.dma_semaphore, #tpu.memory_space<semaphore_mem>>)
    %c15 = arith.constant 15 : index
    %75 = memref.load %arg0[%c15] : memref<16xi32, #tpu.memory_space<smem>>
    %c15_i32 = arith.constant 15 : i32
    %c0_i32_34 = arith.constant 0 : i32
    %76 = tpu.memref_slice %arg1[%75, %c0_i32_34] : memref<1774x64xf32, #tpu.memory_space<any>> -> memref<1x64xf32, #tpu.memory_space<any>>
    %c57_i32 = arith.constant 57 : i32
    %c0_i32_35 = arith.constant 0 : i32
    %77 = tpu.memref_slice %arg8[%c57_i32, %c0_i32_35] : memref<64x64xf32, #tpu.memory_space<vmem>> -> memref<1x64xf32, #tpu.memory_space<vmem>>
    %78 = tpu.memref_slice %arg9[%c15_i32] : memref<16x!tpu.dma_semaphore, #tpu.memory_space<semaphore_mem>> -> memref<1x!tpu.dma_semaphore, #tpu.memory_space<semaphore_mem>>
    %79 = tpu.memref_squeeze %78 : memref<1x!tpu.dma_semaphore, #tpu.memory_space<semaphore_mem>> -> memref<!tpu.dma_semaphore, #tpu.memory_space<semaphore_mem>>
    tpu.enqueue_dma source(%76 : memref<1x64xf32, #tpu.memory_space<any>>) target(%77 : memref<1x64xf32, #tpu.memory_space<vmem>>) target_semaphore(%79 : memref<!tpu.dma_semaphore, #tpu.memory_space<semaphore_mem>>)
    %c0_i32_36 = arith.constant 0 : i32
    %c0_i32_37 = arith.constant 0 : i32
    %80 = tpu.memref_slice %arg1[%0, %c0_i32_37] : memref<1774x64xf32, #tpu.memory_space<any>> -> memref<1x64xf32, #tpu.memory_space<any>>
    %c0_i32_38 = arith.constant 0 : i32
    %c0_i32_39 = arith.constant 0 : i32
    %81 = tpu.memref_slice %arg8[%c0_i32_38, %c0_i32_39] : memref<64x64xf32, #tpu.memory_space<vmem>> -> memref<1x64xf32, #tpu.memory_space<vmem>>
    %82 = tpu.memref_slice %arg9[%c0_i32_36] : memref<16x!tpu.dma_semaphore, #tpu.memory_space<semaphore_mem>> -> memref<1x!tpu.dma_semaphore, #tpu.memory_space<semaphore_mem>>
    %83 = tpu.memref_squeeze %82 : memref<1x!tpu.dma_semaphore, #tpu.memory_space<semaphore_mem>> -> memref<!tpu.dma_semaphore, #tpu.memory_space<semaphore_mem>>
    tpu.wait_dma2 semaphore(%83 : memref<!tpu.dma_semaphore, #tpu.memory_space<semaphore_mem>>) src(%80 : memref<1x64xf32, #tpu.memory_space<any>>) dst(%81 : memref<1x64xf32, #tpu.memory_space<vmem>>)
    %c1_i32_40 = arith.constant 1 : i32
    %c0_i32_41 = arith.constant 0 : i32
    %84 = tpu.memref_slice %arg1[%5, %c0_i32_41] : memref<1774x64xf32, #tpu.memory_space<any>> -> memref<1x64xf32, #tpu.memory_space<any>>
    %c1_i32_42 = arith.constant 1 : i32
    %c0_i32_43 = arith.constant 0 : i32
    %85 = tpu.memref_slice %arg8[%c1_i32_42, %c0_i32_43] : memref<64x64xf32, #tpu.memory_space<vmem>> -> memref<1x64xf32, #tpu.memory_space<vmem>>
    %86 = tpu.memref_slice %arg9[%c1_i32_40] : memref<16x!tpu.dma_semaphore, #tpu.memory_space<semaphore_mem>> -> memref<1x!tpu.dma_semaphore, #tpu.memory_space<semaphore_mem>>
    %87 = tpu.memref_squeeze %86 : memref<1x!tpu.dma_semaphore, #tpu.memory_space<semaphore_mem>> -> memref<!tpu.dma_semaphore, #tpu.memory_space<semaphore_mem>>
    tpu.wait_dma2 semaphore(%87 : memref<!tpu.dma_semaphore, #tpu.memory_space<semaphore_mem>>) src(%84 : memref<1x64xf32, #tpu.memory_space<any>>) dst(%85 : memref<1x64xf32, #tpu.memory_space<vmem>>)
    %c2_i32_44 = arith.constant 2 : i32
    %c0_i32_45 = arith.constant 0 : i32
    %88 = tpu.memref_slice %arg1[%10, %c0_i32_45] : memref<1774x64xf32, #tpu.memory_space<any>> -> memref<1x64xf32, #tpu.memory_space<any>>
    %c8_i32_46 = arith.constant 8 : i32
    %c0_i32_47 = arith.constant 0 : i32
    %89 = tpu.memref_slice %arg8[%c8_i32_46, %c0_i32_47] : memref<64x64xf32, #tpu.memory_space<vmem>> -> memref<1x64xf32, #tpu.memory_space<vmem>>
    %90 = tpu.memref_slice %arg9[%c2_i32_44] : memref<16x!tpu.dma_semaphore, #tpu.memory_space<semaphore_mem>> -> memref<1x!tpu.dma_semaphore, #tpu.memory_space<semaphore_mem>>
    %91 = tpu.memref_squeeze %90 : memref<1x!tpu.dma_semaphore, #tpu.memory_space<semaphore_mem>> -> memref<!tpu.dma_semaphore, #tpu.memory_space<semaphore_mem>>
    tpu.wait_dma2 semaphore(%91 : memref<!tpu.dma_semaphore, #tpu.memory_space<semaphore_mem>>) src(%88 : memref<1x64xf32, #tpu.memory_space<any>>) dst(%89 : memref<1x64xf32, #tpu.memory_space<vmem>>)
    %c3_i32_48 = arith.constant 3 : i32
    %c0_i32_49 = arith.constant 0 : i32
    %92 = tpu.memref_slice %arg1[%15, %c0_i32_49] : memref<1774x64xf32, #tpu.memory_space<any>> -> memref<1x64xf32, #tpu.memory_space<any>>
    %c9_i32_50 = arith.constant 9 : i32
    %c0_i32_51 = arith.constant 0 : i32
    %93 = tpu.memref_slice %arg8[%c9_i32_50, %c0_i32_51] : memref<64x64xf32, #tpu.memory_space<vmem>> -> memref<1x64xf32, #tpu.memory_space<vmem>>
    %94 = tpu.memref_slice %arg9[%c3_i32_48] : memref<16x!tpu.dma_semaphore, #tpu.memory_space<semaphore_mem>> -> memref<1x!tpu.dma_semaphore, #tpu.memory_space<semaphore_mem>>
    %95 = tpu.memref_squeeze %94 : memref<1x!tpu.dma_semaphore, #tpu.memory_space<semaphore_mem>> -> memref<!tpu.dma_semaphore, #tpu.memory_space<semaphore_mem>>
    tpu.wait_dma2 semaphore(%95 : memref<!tpu.dma_semaphore, #tpu.memory_space<semaphore_mem>>) src(%92 : memref<1x64xf32, #tpu.memory_space<any>>) dst(%93 : memref<1x64xf32, #tpu.memory_space<vmem>>)
    %c4_i32_52 = arith.constant 4 : i32
    %c0_i32_53 = arith.constant 0 : i32
    %96 = tpu.memref_slice %arg1[%20, %c0_i32_53] : memref<1774x64xf32, #tpu.memory_space<any>> -> memref<1x64xf32, #tpu.memory_space<any>>
    %c16_i32_54 = arith.constant 16 : i32
    %c0_i32_55 = arith.constant 0 : i32
    %97 = tpu.memref_slice %arg8[%c16_i32_54, %c0_i32_55] : memref<64x64xf32, #tpu.memory_space<vmem>> -> memref<1x64xf32, #tpu.memory_space<vmem>>
    %98 = tpu.memref_slice %arg9[%c4_i32_52] : memref<16x!tpu.dma_semaphore, #tpu.memory_space<semaphore_mem>> -> memref<1x!tpu.dma_semaphore, #tpu.memory_space<semaphore_mem>>
    %99 = tpu.memref_squeeze %98 : memref<1x!tpu.dma_semaphore, #tpu.memory_space<semaphore_mem>> -> memref<!tpu.dma_semaphore, #tpu.memory_space<semaphore_mem>>
    tpu.wait_dma2 semaphore(%99 : memref<!tpu.dma_semaphore, #tpu.memory_space<semaphore_mem>>) src(%96 : memref<1x64xf32, #tpu.memory_space<any>>) dst(%97 : memref<1x64xf32, #tpu.memory_space<vmem>>)
    %c5_i32_56 = arith.constant 5 : i32
    %c0_i32_57 = arith.constant 0 : i32
    %100 = tpu.memref_slice %arg1[%25, %c0_i32_57] : memref<1774x64xf32, #tpu.memory_space<any>> -> memref<1x64xf32, #tpu.memory_space<any>>
    %c17_i32_58 = arith.constant 17 : i32
    %c0_i32_59 = arith.constant 0 : i32
    %101 = tpu.memref_slice %arg8[%c17_i32_58, %c0_i32_59] : memref<64x64xf32, #tpu.memory_space<vmem>> -> memref<1x64xf32, #tpu.memory_space<vmem>>
    %102 = tpu.memref_slice %arg9[%c5_i32_56] : memref<16x!tpu.dma_semaphore, #tpu.memory_space<semaphore_mem>> -> memref<1x!tpu.dma_semaphore, #tpu.memory_space<semaphore_mem>>
    %103 = tpu.memref_squeeze %102 : memref<1x!tpu.dma_semaphore, #tpu.memory_space<semaphore_mem>> -> memref<!tpu.dma_semaphore, #tpu.memory_space<semaphore_mem>>
    tpu.wait_dma2 semaphore(%103 : memref<!tpu.dma_semaphore, #tpu.memory_space<semaphore_mem>>) src(%100 : memref<1x64xf32, #tpu.memory_space<any>>) dst(%101 : memref<1x64xf32, #tpu.memory_space<vmem>>)
    %c6_i32_60 = arith.constant 6 : i32
    %c0_i32_61 = arith.constant 0 : i32
    %104 = tpu.memref_slice %arg1[%30, %c0_i32_61] : memref<1774x64xf32, #tpu.memory_space<any>> -> memref<1x64xf32, #tpu.memory_space<any>>
    %c24_i32_62 = arith.constant 24 : i32
    %c0_i32_63 = arith.constant 0 : i32
    %105 = tpu.memref_slice %arg8[%c24_i32_62, %c0_i32_63] : memref<64x64xf32, #tpu.memory_space<vmem>> -> memref<1x64xf32, #tpu.memory_space<vmem>>
    %106 = tpu.memref_slice %arg9[%c6_i32_60] : memref<16x!tpu.dma_semaphore, #tpu.memory_space<semaphore_mem>> -> memref<1x!tpu.dma_semaphore, #tpu.memory_space<semaphore_mem>>
    %107 = tpu.memref_squeeze %106 : memref<1x!tpu.dma_semaphore, #tpu.memory_space<semaphore_mem>> -> memref<!tpu.dma_semaphore, #tpu.memory_space<semaphore_mem>>
    tpu.wait_dma2 semaphore(%107 : memref<!tpu.dma_semaphore, #tpu.memory_space<semaphore_mem>>) src(%104 : memref<1x64xf32, #tpu.memory_space<any>>) dst(%105 : memref<1x64xf32, #tpu.memory_space<vmem>>)
    %c7_i32_64 = arith.constant 7 : i32
    %c0_i32_65 = arith.constant 0 : i32
    %108 = tpu.memref_slice %arg1[%35, %c0_i32_65] : memref<1774x64xf32, #tpu.memory_space<any>> -> memref<1x64xf32, #tpu.memory_space<any>>
    %c25_i32_66 = arith.constant 25 : i32
    %c0_i32_67 = arith.constant 0 : i32
    %109 = tpu.memref_slice %arg8[%c25_i32_66, %c0_i32_67] : memref<64x64xf32, #tpu.memory_space<vmem>> -> memref<1x64xf32, #tpu.memory_space<vmem>>
    %110 = tpu.memref_slice %arg9[%c7_i32_64] : memref<16x!tpu.dma_semaphore, #tpu.memory_space<semaphore_mem>> -> memref<1x!tpu.dma_semaphore, #tpu.memory_space<semaphore_mem>>
    %111 = tpu.memref_squeeze %110 : memref<1x!tpu.dma_semaphore, #tpu.memory_space<semaphore_mem>> -> memref<!tpu.dma_semaphore, #tpu.memory_space<semaphore_mem>>
    tpu.wait_dma2 semaphore(%111 : memref<!tpu.dma_semaphore, #tpu.memory_space<semaphore_mem>>) src(%108 : memref<1x64xf32, #tpu.memory_space<any>>) dst(%109 : memref<1x64xf32, #tpu.memory_space<vmem>>)
    %c8_i32_68 = arith.constant 8 : i32
    %c0_i32_69 = arith.constant 0 : i32
    %112 = tpu.memref_slice %arg1[%40, %c0_i32_69] : memref<1774x64xf32, #tpu.memory_space<any>> -> memref<1x64xf32, #tpu.memory_space<any>>
    %c32_i32_70 = arith.constant 32 : i32
    %c0_i32_71 = arith.constant 0 : i32
    %113 = tpu.memref_slice %arg8[%c32_i32_70, %c0_i32_71] : memref<64x64xf32, #tpu.memory_space<vmem>> -> memref<1x64xf32, #tpu.memory_space<vmem>>
    %114 = tpu.memref_slice %arg9[%c8_i32_68] : memref<16x!tpu.dma_semaphore, #tpu.memory_space<semaphore_mem>> -> memref<1x!tpu.dma_semaphore, #tpu.memory_space<semaphore_mem>>
    %115 = tpu.memref_squeeze %114 : memref<1x!tpu.dma_semaphore, #tpu.memory_space<semaphore_mem>> -> memref<!tpu.dma_semaphore, #tpu.memory_space<semaphore_mem>>
    tpu.wait_dma2 semaphore(%115 : memref<!tpu.dma_semaphore, #tpu.memory_space<semaphore_mem>>) src(%112 : memref<1x64xf32, #tpu.memory_space<any>>) dst(%113 : memref<1x64xf32, #tpu.memory_space<vmem>>)
    %c9_i32_72 = arith.constant 9 : i32
    %c0_i32_73 = arith.constant 0 : i32
    %116 = tpu.memref_slice %arg1[%45, %c0_i32_73] : memref<1774x64xf32, #tpu.memory_space<any>> -> memref<1x64xf32, #tpu.memory_space<any>>
    %c33_i32_74 = arith.constant 33 : i32
    %c0_i32_75 = arith.constant 0 : i32
    %117 = tpu.memref_slice %arg8[%c33_i32_74, %c0_i32_75] : memref<64x64xf32, #tpu.memory_space<vmem>> -> memref<1x64xf32, #tpu.memory_space<vmem>>
    %118 = tpu.memref_slice %arg9[%c9_i32_72] : memref<16x!tpu.dma_semaphore, #tpu.memory_space<semaphore_mem>> -> memref<1x!tpu.dma_semaphore, #tpu.memory_space<semaphore_mem>>
    %119 = tpu.memref_squeeze %118 : memref<1x!tpu.dma_semaphore, #tpu.memory_space<semaphore_mem>> -> memref<!tpu.dma_semaphore, #tpu.memory_space<semaphore_mem>>
    tpu.wait_dma2 semaphore(%119 : memref<!tpu.dma_semaphore, #tpu.memory_space<semaphore_mem>>) src(%116 : memref<1x64xf32, #tpu.memory_space<any>>) dst(%117 : memref<1x64xf32, #tpu.memory_space<vmem>>)
    %c10_i32_76 = arith.constant 10 : i32
    %c0_i32_77 = arith.constant 0 : i32
    %120 = tpu.memref_slice %arg1[%50, %c0_i32_77] : memref<1774x64xf32, #tpu.memory_space<any>> -> memref<1x64xf32, #tpu.memory_space<any>>
    %c40_i32_78 = arith.constant 40 : i32
    %c0_i32_79 = arith.constant 0 : i32
    %121 = tpu.memref_slice %arg8[%c40_i32_78, %c0_i32_79] : memref<64x64xf32, #tpu.memory_space<vmem>> -> memref<1x64xf32, #tpu.memory_space<vmem>>
    %122 = tpu.memref_slice %arg9[%c10_i32_76] : memref<16x!tpu.dma_semaphore, #tpu.memory_space<semaphore_mem>> -> memref<1x!tpu.dma_semaphore, #tpu.memory_space<semaphore_mem>>
    %123 = tpu.memref_squeeze %122 : memref<1x!tpu.dma_semaphore, #tpu.memory_space<semaphore_mem>> -> memref<!tpu.dma_semaphore, #tpu.memory_space<semaphore_mem>>
    tpu.wait_dma2 semaphore(%123 : memref<!tpu.dma_semaphore, #tpu.memory_space<semaphore_mem>>) src(%120 : memref<1x64xf32, #tpu.memory_space<any>>) dst(%121 : memref<1x64xf32, #tpu.memory_space<vmem>>)
    %c11_i32_80 = arith.constant 11 : i32
    %c0_i32_81 = arith.constant 0 : i32
    %124 = tpu.memref_slice %arg1[%55, %c0_i32_81] : memref<1774x64xf32, #tpu.memory_space<any>> -> memref<1x64xf32, #tpu.memory_space<any>>
    %c41_i32_82 = arith.constant 41 : i32
    %c0_i32_83 = arith.constant 0 : i32
    %125 = tpu.memref_slice %arg8[%c41_i32_82, %c0_i32_83] : memref<64x64xf32, #tpu.memory_space<vmem>> -> memref<1x64xf32, #tpu.memory_space<vmem>>
    %126 = tpu.memref_slice %arg9[%c11_i32_80] : memref<16x!tpu.dma_semaphore, #tpu.memory_space<semaphore_mem>> -> memref<1x!tpu.dma_semaphore, #tpu.memory_space<semaphore_mem>>
    %127 = tpu.memref_squeeze %126 : memref<1x!tpu.dma_semaphore, #tpu.memory_space<semaphore_mem>> -> memref<!tpu.dma_semaphore, #tpu.memory_space<semaphore_mem>>
    tpu.wait_dma2 semaphore(%127 : memref<!tpu.dma_semaphore, #tpu.memory_space<semaphore_mem>>) src(%124 : memref<1x64xf32, #tpu.memory_space<any>>) dst(%125 : memref<1x64xf32, #tpu.memory_space<vmem>>)
    %c12_i32_84 = arith.constant 12 : i32
    %c0_i32_85 = arith.constant 0 : i32
    %128 = tpu.memref_slice %arg1[%60, %c0_i32_85] : memref<1774x64xf32, #tpu.memory_space<any>> -> memref<1x64xf32, #tpu.memory_space<any>>
    %c48_i32_86 = arith.constant 48 : i32
    %c0_i32_87 = arith.constant 0 : i32
    %129 = tpu.memref_slice %arg8[%c48_i32_86, %c0_i32_87] : memref<64x64xf32, #tpu.memory_space<vmem>> -> memref<1x64xf32, #tpu.memory_space<vmem>>
    %130 = tpu.memref_slice %arg9[%c12_i32_84] : memref<16x!tpu.dma_semaphore, #tpu.memory_space<semaphore_mem>> -> memref<1x!tpu.dma_semaphore, #tpu.memory_space<semaphore_mem>>
    %131 = tpu.memref_squeeze %130 : memref<1x!tpu.dma_semaphore, #tpu.memory_space<semaphore_mem>> -> memref<!tpu.dma_semaphore, #tpu.memory_space<semaphore_mem>>
    tpu.wait_dma2 semaphore(%131 : memref<!tpu.dma_semaphore, #tpu.memory_space<semaphore_mem>>) src(%128 : memref<1x64xf32, #tpu.memory_space<any>>) dst(%129 : memref<1x64xf32, #tpu.memory_space<vmem>>)
    %c13_i32_88 = arith.constant 13 : i32
    %c0_i32_89 = arith.constant 0 : i32
    %132 = tpu.memref_slice %arg1[%65, %c0_i32_89] : memref<1774x64xf32, #tpu.memory_space<any>> -> memref<1x64xf32, #tpu.memory_space<any>>
    %c49_i32_90 = arith.constant 49 : i32
    %c0_i32_91 = arith.constant 0 : i32
    %133 = tpu.memref_slice %arg8[%c49_i32_90, %c0_i32_91] : memref<64x64xf32, #tpu.memory_space<vmem>> -> memref<1x64xf32, #tpu.memory_space<vmem>>
    %134 = tpu.memref_slice %arg9[%c13_i32_88] : memref<16x!tpu.dma_semaphore, #tpu.memory_space<semaphore_mem>> -> memref<1x!tpu.dma_semaphore, #tpu.memory_space<semaphore_mem>>
    %135 = tpu.memref_squeeze %134 : memref<1x!tpu.dma_semaphore, #tpu.memory_space<semaphore_mem>> -> memref<!tpu.dma_semaphore, #tpu.memory_space<semaphore_mem>>
    tpu.wait_dma2 semaphore(%135 : memref<!tpu.dma_semaphore, #tpu.memory_space<semaphore_mem>>) src(%132 : memref<1x64xf32, #tpu.memory_space<any>>) dst(%133 : memref<1x64xf32, #tpu.memory_space<vmem>>)
    %c14_i32_92 = arith.constant 14 : i32
    %c0_i32_93 = arith.constant 0 : i32
    %136 = tpu.memref_slice %arg1[%70, %c0_i32_93] : memref<1774x64xf32, #tpu.memory_space<any>> -> memref<1x64xf32, #tpu.memory_space<any>>
    %c56_i32_94 = arith.constant 56 : i32
    %c0_i32_95 = arith.constant 0 : i32
    %137 = tpu.memref_slice %arg8[%c56_i32_94, %c0_i32_95] : memref<64x64xf32, #tpu.memory_space<vmem>> -> memref<1x64xf32, #tpu.memory_space<vmem>>
    %138 = tpu.memref_slice %arg9[%c14_i32_92] : memref<16x!tpu.dma_semaphore, #tpu.memory_space<semaphore_mem>> -> memref<1x!tpu.dma_semaphore, #tpu.memory_space<semaphore_mem>>
    %139 = tpu.memref_squeeze %138 : memref<1x!tpu.dma_semaphore, #tpu.memory_space<semaphore_mem>> -> memref<!tpu.dma_semaphore, #tpu.memory_space<semaphore_mem>>
    tpu.wait_dma2 semaphore(%139 : memref<!tpu.dma_semaphore, #tpu.memory_space<semaphore_mem>>) src(%136 : memref<1x64xf32, #tpu.memory_space<any>>) dst(%137 : memref<1x64xf32, #tpu.memory_space<vmem>>)
    %c15_i32_96 = arith.constant 15 : i32
    %c0_i32_97 = arith.constant 0 : i32
    %140 = tpu.memref_slice %arg1[%75, %c0_i32_97] : memref<1774x64xf32, #tpu.memory_space<any>> -> memref<1x64xf32, #tpu.memory_space<any>>
    %c57_i32_98 = arith.constant 57 : i32
    %c0_i32_99 = arith.constant 0 : i32
    %141 = tpu.memref_slice %arg8[%c57_i32_98, %c0_i32_99] : memref<64x64xf32, #tpu.memory_space<vmem>> -> memref<1x64xf32, #tpu.memory_space<vmem>>
    %142 = tpu.memref_slice %arg9[%c15_i32_96] : memref<16x!tpu.dma_semaphore, #tpu.memory_space<semaphore_mem>> -> memref<1x!tpu.dma_semaphore, #tpu.memory_space<semaphore_mem>>
    %143 = tpu.memref_squeeze %142 : memref<1x!tpu.dma_semaphore, #tpu.memory_space<semaphore_mem>> -> memref<!tpu.dma_semaphore, #tpu.memory_space<semaphore_mem>>
    tpu.wait_dma2 semaphore(%143 : memref<!tpu.dma_semaphore, #tpu.memory_space<semaphore_mem>>) src(%140 : memref<1x64xf32, #tpu.memory_space<any>>) dst(%141 : memref<1x64xf32, #tpu.memory_space<vmem>>)
    %c0_100 = arith.constant 0 : index
    %c0_101 = arith.constant 0 : index
    %144 = vector.load %arg8[%c0_100, %c0_101] : memref<64x64xf32, #tpu.memory_space<vmem>>, vector<64x64xf32>
    %c0_102 = arith.constant 0 : index
    %c0_103 = arith.constant 0 : index
    %145 = vector.load %arg2[%c0_102, %c0_103] : memref<64x128xf32, #tpu.memory_space<vmem>>, vector<64x128xf32>
    %cst = arith.constant dense<0.000000e+00> : vector<64x128xf32>
    %146 = tpu.matmul %144, %145, %cst {dimension_numbers = #tpu.dot_dimension_numbers<[1], [0], [0], [1], [0, 0, 1, 1], [], []>} : vector<64x64xf32>, vector<64x128xf32>, vector<64x128xf32> -> vector<64x128xf32>
    %c0_104 = arith.constant 0 : index
    %c0_105 = arith.constant 0 : index
    %147 = vector.load %arg4[%c0_104, %c0_105] : memref<1x128xf32, #tpu.memory_space<vmem>>, vector<1x128xf32>
    %148 = vector.broadcast %147 : vector<1x128xf32> to vector<64x128xf32>
    %149 = arith.addf %146, %148 : vector<64x128xf32>
    %c0_106 = arith.constant 0 : index
    %c0_107 = arith.constant 0 : index
    %150 = vector.load %arg3[%c0_106, %c0_107] : memref<32x128xf32, #tpu.memory_space<vmem>>, vector<32x128xf32>
    %151 = tpu.iota {dimensions = array<i32: 0>} : vector<8x1xi32>
    %c2_i32_108 = arith.constant 2 : i32
    %152 = vector.broadcast %c2_i32_108 : i32 to vector<8x1xi32>
    %153 = arith.cmpi slt, %151, %152 : vector<8x1xi32>
    %cst_109 = arith.constant 0.000000e+00 : f32
    %154 = vector.broadcast %cst_109 : f32 to vector<8x32xf32>
    %cst_110 = arith.constant 0.000000e+00 : f32
    %155 = vector.broadcast %cst_110 : f32 to vector<8x32xf32>
    %156 = vector.extract_strided_slice %149 {offsets = [0, 0], sizes = [8, 128], strides = [1, 1]} : vector<64x128xf32> to vector<8x128xf32>
    %cst_111 = arith.constant dense<0.000000e+00> : vector<8x128xf32>
    %157 = tpu.matmul %154, %150, %cst_111 {dimension_numbers = #tpu.dot_dimension_numbers<[1], [0], [0], [1], [0, 0, 1, 1], [], []>} : vector<8x32xf32>, vector<32x128xf32>, vector<8x128xf32> -> vector<8x128xf32>
    %158 = arith.addf %156, %157 : vector<8x128xf32>
    %159 = vector.extract_strided_slice %158 {offsets = [0, 0], sizes = [8, 96], strides = [1, 1]} : vector<8x128xf32> to vector<8x96xf32>
    %cst_112 = arith.constant 5.000000e-01 : f32
    %160 = vector.broadcast %cst_112 : f32 to vector<8x96xf32>
    %161 = arith.mulf %160, %159 : vector<8x96xf32>
    %162 = math.tanh %161 : vector<8x96xf32>
    %cst_113 = arith.constant 5.000000e-01 : f32
    %163 = vector.broadcast %cst_113 : f32 to vector<8x96xf32>
    %164 = arith.mulf %163, %162 : vector<8x96xf32>
    %cst_114 = arith.constant 5.000000e-01 : f32
    %165 = vector.broadcast %cst_114 : f32 to vector<8x96xf32>
    %166 = arith.addf %164, %165 : vector<8x96xf32>
    %167 = vector.extract_strided_slice %158 {offsets = [0, 96], sizes = [8, 32], strides = [1, 1]} : vector<8x128xf32> to vector<8x32xf32>
    %168 = math.tanh %167 : vector<8x32xf32>
    %169 = vector.extract_strided_slice %166 {offsets = [0, 0], sizes = [8, 32], strides = [1, 1]} : vector<8x96xf32> to vector<8x32xf32>
    %170 = vector.extract_strided_slice %166 {offsets = [0, 32], sizes = [8, 32], strides = [1, 1]} : vector<8x96xf32> to vector<8x32xf32>
    %171 = vector.extract_strided_slice %166 {offsets = [0, 64], sizes = [8, 32], strides = [1, 1]} : vector<8x96xf32> to vector<8x32xf32>
    %172 = arith.mulf %170, %155 : vector<8x32xf32>
    %173 = arith.mulf %169, %168 : vector<8x32xf32>
    %174 = arith.addf %172, %173 : vector<8x32xf32>
    %175 = math.tanh %174 : vector<8x32xf32>
    %176 = arith.mulf %171, %175 : vector<8x32xf32>
    %cst_115 = arith.constant 0.000000e+00 : f32
    %177 = vector.shape_cast %153 : vector<8x1xi1> to vector<8x1xi1>
    %178 = vector.broadcast %177 : vector<8x1xi1> to vector<8x32xi1>
    %179 = vector.broadcast %cst_115 : f32 to vector<8x32xf32>
    %180 = arith.select %178, %176, %179 : vector<8x32xi1>, vector<8x32xf32>
    %cst_116 = arith.constant dense<0.000000e+00> : vector<32xf32>
    %181 = vector.multi_reduction <add>, %180, %cst_116 [0] : vector<8x32xf32> to vector<32xf32>
    %182 = vector.shape_cast %181 : vector<32xf32> to vector<1x32xf32>
    %cst_117 = arith.constant 5.000000e-01 : f32
    %183 = vector.broadcast %cst_117 : f32 to vector<1x32xf32>
    %184 = arith.mulf %182, %183 : vector<1x32xf32>
    %185 = vector.extract_strided_slice %149 {offsets = [8, 0], sizes = [8, 128], strides = [1, 1]} : vector<64x128xf32> to vector<8x128xf32>
    %cst_118 = arith.constant dense<0.000000e+00> : vector<8x128xf32>
    %186 = tpu.matmul %176, %150, %cst_118 {dimension_numbers = #tpu.dot_dimension_numbers<[1], [0], [0], [1], [0, 0, 1, 1], [], []>} : vector<8x32xf32>, vector<32x128xf32>, vector<8x128xf32> -> vector<8x128xf32>
    %187 = arith.addf %185, %186 : vector<8x128xf32>
    %188 = vector.extract_strided_slice %187 {offsets = [0, 0], sizes = [8, 96], strides = [1, 1]} : vector<8x128xf32> to vector<8x96xf32>
    %cst_119 = arith.constant 5.000000e-01 : f32
    %189 = vector.broadcast %cst_119 : f32 to vector<8x96xf32>
    %190 = arith.mulf %189, %188 : vector<8x96xf32>
    %191 = math.tanh %190 : vector<8x96xf32>
    %cst_120 = arith.constant 5.000000e-01 : f32
    %192 = vector.broadcast %cst_120 : f32 to vector<8x96xf32>
    %193 = arith.mulf %192, %191 : vector<8x96xf32>
    %cst_121 = arith.constant 5.000000e-01 : f32
    %194 = vector.broadcast %cst_121 : f32 to vector<8x96xf32>
    %195 = arith.addf %193, %194 : vector<8x96xf32>
    %196 = vector.extract_strided_slice %187 {offsets = [0, 96], sizes = [8, 32], strides = [1, 1]} : vector<8x128xf32> to vector<8x32xf32>
    %197 = math.tanh %196 : vector<8x32xf32>
    %198 = vector.extract_strided_slice %195 {offsets = [0, 0], sizes = [8, 32], strides = [1, 1]} : vector<8x96xf32> to vector<8x32xf32>
    %199 = vector.extract_strided_slice %195 {offsets = [0, 32], sizes = [8, 32], strides = [1, 1]} : vector<8x96xf32> to vector<8x32xf32>
    %200 = vector.extract_strided_slice %195 {offsets = [0, 64], sizes = [8, 32], strides = [1, 1]} : vector<8x96xf32> to vector<8x32xf32>
    %201 = arith.mulf %199, %174 : vector<8x32xf32>
    %202 = arith.mulf %198, %197 : vector<8x32xf32>
    %203 = arith.addf %201, %202 : vector<8x32xf32>
    %204 = math.tanh %203 : vector<8x32xf32>
    %205 = arith.mulf %200, %204 : vector<8x32xf32>
    %cst_122 = arith.constant 0.000000e+00 : f32
    %206 = vector.shape_cast %153 : vector<8x1xi1> to vector<8x1xi1>
    %207 = vector.broadcast %206 : vector<8x1xi1> to vector<8x32xi1>
    %208 = vector.broadcast %cst_122 : f32 to vector<8x32xf32>
    %209 = arith.select %207, %205, %208 : vector<8x32xi1>, vector<8x32xf32>
    %cst_123 = arith.constant dense<0.000000e+00> : vector<32xf32>
    %210 = vector.multi_reduction <add>, %209, %cst_123 [0] : vector<8x32xf32> to vector<32xf32>
    %211 = vector.shape_cast %210 : vector<32xf32> to vector<1x32xf32>
    %cst_124 = arith.constant 5.000000e-01 : f32
    %212 = vector.broadcast %cst_124 : f32 to vector<1x32xf32>
    %213 = arith.mulf %211, %212 : vector<1x32xf32>
    %214 = vector.extract_strided_slice %149 {offsets = [16, 0], sizes = [8, 128], strides = [1, 1]} : vector<64x128xf32> to vector<8x128xf32>
    %cst_125 = arith.constant dense<0.000000e+00> : vector<8x128xf32>
    %215 = tpu.matmul %205, %150, %cst_125 {dimension_numbers = #tpu.dot_dimension_numbers<[1], [0], [0], [1], [0, 0, 1, 1], [], []>} : vector<8x32xf32>, vector<32x128xf32>, vector<8x128xf32> -> vector<8x128xf32>
    %216 = arith.addf %214, %215 : vector<8x128xf32>
    %217 = vector.extract_strided_slice %216 {offsets = [0, 0], sizes = [8, 96], strides = [1, 1]} : vector<8x128xf32> to vector<8x96xf32>
    %cst_126 = arith.constant 5.000000e-01 : f32
    %218 = vector.broadcast %cst_126 : f32 to vector<8x96xf32>
    %219 = arith.mulf %218, %217 : vector<8x96xf32>
    %220 = math.tanh %219 : vector<8x96xf32>
    %cst_127 = arith.constant 5.000000e-01 : f32
    %221 = vector.broadcast %cst_127 : f32 to vector<8x96xf32>
    %222 = arith.mulf %221, %220 : vector<8x96xf32>
    %cst_128 = arith.constant 5.000000e-01 : f32
    %223 = vector.broadcast %cst_128 : f32 to vector<8x96xf32>
    %224 = arith.addf %222, %223 : vector<8x96xf32>
    %225 = vector.extract_strided_slice %216 {offsets = [0, 96], sizes = [8, 32], strides = [1, 1]} : vector<8x128xf32> to vector<8x32xf32>
    %226 = math.tanh %225 : vector<8x32xf32>
    %227 = vector.extract_strided_slice %224 {offsets = [0, 0], sizes = [8, 32], strides = [1, 1]} : vector<8x96xf32> to vector<8x32xf32>
    %228 = vector.extract_strided_slice %224 {offsets = [0, 32], sizes = [8, 32], strides = [1, 1]} : vector<8x96xf32> to vector<8x32xf32>
    %229 = vector.extract_strided_slice %224 {offsets = [0, 64], sizes = [8, 32], strides = [1, 1]} : vector<8x96xf32> to vector<8x32xf32>
    %230 = arith.mulf %228, %203 : vector<8x32xf32>
    %231 = arith.mulf %227, %226 : vector<8x32xf32>
    %232 = arith.addf %230, %231 : vector<8x32xf32>
    %233 = math.tanh %232 : vector<8x32xf32>
    %234 = arith.mulf %229, %233 : vector<8x32xf32>
    %cst_129 = arith.constant 0.000000e+00 : f32
    %235 = vector.shape_cast %153 : vector<8x1xi1> to vector<8x1xi1>
    %236 = vector.broadcast %235 : vector<8x1xi1> to vector<8x32xi1>
    %237 = vector.broadcast %cst_129 : f32 to vector<8x32xf32>
    %238 = arith.select %236, %234, %237 : vector<8x32xi1>, vector<8x32xf32>
    %cst_130 = arith.constant dense<0.000000e+00> : vector<32xf32>
    %239 = vector.multi_reduction <add>, %238, %cst_130 [0] : vector<8x32xf32> to vector<32xf32>
    %240 = vector.shape_cast %239 : vector<32xf32> to vector<1x32xf32>
    %cst_131 = arith.constant 5.000000e-01 : f32
    %241 = vector.broadcast %cst_131 : f32 to vector<1x32xf32>
    %242 = arith.mulf %240, %241 : vector<1x32xf32>
    %243 = vector.extract_strided_slice %149 {offsets = [24, 0], sizes = [8, 128], strides = [1, 1]} : vector<64x128xf32> to vector<8x128xf32>
    %cst_132 = arith.constant dense<0.000000e+00> : vector<8x128xf32>
    %244 = tpu.matmul %234, %150, %cst_132 {dimension_numbers = #tpu.dot_dimension_numbers<[1], [0], [0], [1], [0, 0, 1, 1], [], []>} : vector<8x32xf32>, vector<32x128xf32>, vector<8x128xf32> -> vector<8x128xf32>
    %245 = arith.addf %243, %244 : vector<8x128xf32>
    %246 = vector.extract_strided_slice %245 {offsets = [0, 0], sizes = [8, 96], strides = [1, 1]} : vector<8x128xf32> to vector<8x96xf32>
    %cst_133 = arith.constant 5.000000e-01 : f32
    %247 = vector.broadcast %cst_133 : f32 to vector<8x96xf32>
    %248 = arith.mulf %247, %246 : vector<8x96xf32>
    %249 = math.tanh %248 : vector<8x96xf32>
    %cst_134 = arith.constant 5.000000e-01 : f32
    %250 = vector.broadcast %cst_134 : f32 to vector<8x96xf32>
    %251 = arith.mulf %250, %249 : vector<8x96xf32>
    %cst_135 = arith.constant 5.000000e-01 : f32
    %252 = vector.broadcast %cst_135 : f32 to vector<8x96xf32>
    %253 = arith.addf %251, %252 : vector<8x96xf32>
    %254 = vector.extract_strided_slice %245 {offsets = [0, 96], sizes = [8, 32], strides = [1, 1]} : vector<8x128xf32> to vector<8x32xf32>
    %255 = math.tanh %254 : vector<8x32xf32>
    %256 = vector.extract_strided_slice %253 {offsets = [0, 0], sizes = [8, 32], strides = [1, 1]} : vector<8x96xf32> to vector<8x32xf32>
    %257 = vector.extract_strided_slice %253 {offsets = [0, 32], sizes = [8, 32], strides = [1, 1]} : vector<8x96xf32> to vector<8x32xf32>
    %258 = vector.extract_strided_slice %253 {offsets = [0, 64], sizes = [8, 32], strides = [1, 1]} : vector<8x96xf32> to vector<8x32xf32>
    %259 = arith.mulf %257, %232 : vector<8x32xf32>
    %260 = arith.mulf %256, %255 : vector<8x32xf32>
    %261 = arith.addf %259, %260 : vector<8x32xf32>
    %262 = math.tanh %261 : vector<8x32xf32>
    %263 = arith.mulf %258, %262 : vector<8x32xf32>
    %cst_136 = arith.constant 0.000000e+00 : f32
    %264 = vector.shape_cast %153 : vector<8x1xi1> to vector<8x1xi1>
    %265 = vector.broadcast %264 : vector<8x1xi1> to vector<8x32xi1>
    %266 = vector.broadcast %cst_136 : f32 to vector<8x32xf32>
    %267 = arith.select %265, %263, %266 : vector<8x32xi1>, vector<8x32xf32>
    %cst_137 = arith.constant dense<0.000000e+00> : vector<32xf32>
    %268 = vector.multi_reduction <add>, %267, %cst_137 [0] : vector<8x32xf32> to vector<32xf32>
    %269 = vector.shape_cast %268 : vector<32xf32> to vector<1x32xf32>
    %cst_138 = arith.constant 5.000000e-01 : f32
    %270 = vector.broadcast %cst_138 : f32 to vector<1x32xf32>
    %271 = arith.mulf %269, %270 : vector<1x32xf32>
    %272 = vector.extract_strided_slice %149 {offsets = [32, 0], sizes = [8, 128], strides = [1, 1]} : vector<64x128xf32> to vector<8x128xf32>
    %cst_139 = arith.constant dense<0.000000e+00> : vector<8x128xf32>
    %273 = tpu.matmul %263, %150, %cst_139 {dimension_numbers = #tpu.dot_dimension_numbers<[1], [0], [0], [1], [0, 0, 1, 1], [], []>} : vector<8x32xf32>, vector<32x128xf32>, vector<8x128xf32> -> vector<8x128xf32>
    %274 = arith.addf %272, %273 : vector<8x128xf32>
    %275 = vector.extract_strided_slice %274 {offsets = [0, 0], sizes = [8, 96], strides = [1, 1]} : vector<8x128xf32> to vector<8x96xf32>
    %cst_140 = arith.constant 5.000000e-01 : f32
    %276 = vector.broadcast %cst_140 : f32 to vector<8x96xf32>
    %277 = arith.mulf %276, %275 : vector<8x96xf32>
    %278 = math.tanh %277 : vector<8x96xf32>
    %cst_141 = arith.constant 5.000000e-01 : f32
    %279 = vector.broadcast %cst_141 : f32 to vector<8x96xf32>
    %280 = arith.mulf %279, %278 : vector<8x96xf32>
    %cst_142 = arith.constant 5.000000e-01 : f32
    %281 = vector.broadcast %cst_142 : f32 to vector<8x96xf32>
    %282 = arith.addf %280, %281 : vector<8x96xf32>
    %283 = vector.extract_strided_slice %274 {offsets = [0, 96], sizes = [8, 32], strides = [1, 1]} : vector<8x128xf32> to vector<8x32xf32>
    %284 = math.tanh %283 : vector<8x32xf32>
    %285 = vector.extract_strided_slice %282 {offsets = [0, 0], sizes = [8, 32], strides = [1, 1]} : vector<8x96xf32> to vector<8x32xf32>
    %286 = vector.extract_strided_slice %282 {offsets = [0, 32], sizes = [8, 32], strides = [1, 1]} : vector<8x96xf32> to vector<8x32xf32>
    %287 = vector.extract_strided_slice %282 {offsets = [0, 64], sizes = [8, 32], strides = [1, 1]} : vector<8x96xf32> to vector<8x32xf32>
    %288 = arith.mulf %286, %261 : vector<8x32xf32>
    %289 = arith.mulf %285, %284 : vector<8x32xf32>
    %290 = arith.addf %288, %289 : vector<8x32xf32>
    %291 = math.tanh %290 : vector<8x32xf32>
    %292 = arith.mulf %287, %291 : vector<8x32xf32>
    %cst_143 = arith.constant 0.000000e+00 : f32
    %293 = vector.shape_cast %153 : vector<8x1xi1> to vector<8x1xi1>
    %294 = vector.broadcast %293 : vector<8x1xi1> to vector<8x32xi1>
    %295 = vector.broadcast %cst_143 : f32 to vector<8x32xf32>
    %296 = arith.select %294, %292, %295 : vector<8x32xi1>, vector<8x32xf32>
    %cst_144 = arith.constant dense<0.000000e+00> : vector<32xf32>
    %297 = vector.multi_reduction <add>, %296, %cst_144 [0] : vector<8x32xf32> to vector<32xf32>
    %298 = vector.shape_cast %297 : vector<32xf32> to vector<1x32xf32>
    %cst_145 = arith.constant 5.000000e-01 : f32
    %299 = vector.broadcast %cst_145 : f32 to vector<1x32xf32>
    %300 = arith.mulf %298, %299 : vector<1x32xf32>
    %301 = vector.extract_strided_slice %149 {offsets = [40, 0], sizes = [8, 128], strides = [1, 1]} : vector<64x128xf32> to vector<8x128xf32>
    %cst_146 = arith.constant dense<0.000000e+00> : vector<8x128xf32>
    %302 = tpu.matmul %292, %150, %cst_146 {dimension_numbers = #tpu.dot_dimension_numbers<[1], [0], [0], [1], [0, 0, 1, 1], [], []>} : vector<8x32xf32>, vector<32x128xf32>, vector<8x128xf32> -> vector<8x128xf32>
    %303 = arith.addf %301, %302 : vector<8x128xf32>
    %304 = vector.extract_strided_slice %303 {offsets = [0, 0], sizes = [8, 96], strides = [1, 1]} : vector<8x128xf32> to vector<8x96xf32>
    %cst_147 = arith.constant 5.000000e-01 : f32
    %305 = vector.broadcast %cst_147 : f32 to vector<8x96xf32>
    %306 = arith.mulf %305, %304 : vector<8x96xf32>
    %307 = math.tanh %306 : vector<8x96xf32>
    %cst_148 = arith.constant 5.000000e-01 : f32
    %308 = vector.broadcast %cst_148 : f32 to vector<8x96xf32>
    %309 = arith.mulf %308, %307 : vector<8x96xf32>
    %cst_149 = arith.constant 5.000000e-01 : f32
    %310 = vector.broadcast %cst_149 : f32 to vector<8x96xf32>
    %311 = arith.addf %309, %310 : vector<8x96xf32>
    %312 = vector.extract_strided_slice %303 {offsets = [0, 96], sizes = [8, 32], strides = [1, 1]} : vector<8x128xf32> to vector<8x32xf32>
    %313 = math.tanh %312 : vector<8x32xf32>
    %314 = vector.extract_strided_slice %311 {offsets = [0, 0], sizes = [8, 32], strides = [1, 1]} : vector<8x96xf32> to vector<8x32xf32>
    %315 = vector.extract_strided_slice %311 {offsets = [0, 32], sizes = [8, 32], strides = [1, 1]} : vector<8x96xf32> to vector<8x32xf32>
    %316 = vector.extract_strided_slice %311 {offsets = [0, 64], sizes = [8, 32], strides = [1, 1]} : vector<8x96xf32> to vector<8x32xf32>
    %317 = arith.mulf %315, %290 : vector<8x32xf32>
    %318 = arith.mulf %314, %313 : vector<8x32xf32>
    %319 = arith.addf %317, %318 : vector<8x32xf32>
    %320 = math.tanh %319 : vector<8x32xf32>
    %321 = arith.mulf %316, %320 : vector<8x32xf32>
    %cst_150 = arith.constant 0.000000e+00 : f32
    %322 = vector.shape_cast %153 : vector<8x1xi1> to vector<8x1xi1>
    %323 = vector.broadcast %322 : vector<8x1xi1> to vector<8x32xi1>
    %324 = vector.broadcast %cst_150 : f32 to vector<8x32xf32>
    %325 = arith.select %323, %321, %324 : vector<8x32xi1>, vector<8x32xf32>
    %cst_151 = arith.constant dense<0.000000e+00> : vector<32xf32>
    %326 = vector.multi_reduction <add>, %325, %cst_151 [0] : vector<8x32xf32> to vector<32xf32>
    %327 = vector.shape_cast %326 : vector<32xf32> to vector<1x32xf32>
    %cst_152 = arith.constant 5.000000e-01 : f32
    %328 = vector.broadcast %cst_152 : f32 to vector<1x32xf32>
    %329 = arith.mulf %327, %328 : vector<1x32xf32>
    %330 = vector.extract_strided_slice %149 {offsets = [48, 0], sizes = [8, 128], strides = [1, 1]} : vector<64x128xf32> to vector<8x128xf32>
    %cst_153 = arith.constant dense<0.000000e+00> : vector<8x128xf32>
    %331 = tpu.matmul %321, %150, %cst_153 {dimension_numbers = #tpu.dot_dimension_numbers<[1], [0], [0], [1], [0, 0, 1, 1], [], []>} : vector<8x32xf32>, vector<32x128xf32>, vector<8x128xf32> -> vector<8x128xf32>
    %332 = arith.addf %330, %331 : vector<8x128xf32>
    %333 = vector.extract_strided_slice %332 {offsets = [0, 0], sizes = [8, 96], strides = [1, 1]} : vector<8x128xf32> to vector<8x96xf32>
    %cst_154 = arith.constant 5.000000e-01 : f32
    %334 = vector.broadcast %cst_154 : f32 to vector<8x96xf32>
    %335 = arith.mulf %334, %333 : vector<8x96xf32>
    %336 = math.tanh %335 : vector<8x96xf32>
    %cst_155 = arith.constant 5.000000e-01 : f32
    %337 = vector.broadcast %cst_155 : f32 to vector<8x96xf32>
    %338 = arith.mulf %337, %336 : vector<8x96xf32>
    %cst_156 = arith.constant 5.000000e-01 : f32
    %339 = vector.broadcast %cst_156 : f32 to vector<8x96xf32>
    %340 = arith.addf %338, %339 : vector<8x96xf32>
    %341 = vector.extract_strided_slice %332 {offsets = [0, 96], sizes = [8, 32], strides = [1, 1]} : vector<8x128xf32> to vector<8x32xf32>
    %342 = math.tanh %341 : vector<8x32xf32>
    %343 = vector.extract_strided_slice %340 {offsets = [0, 0], sizes = [8, 32], strides = [1, 1]} : vector<8x96xf32> to vector<8x32xf32>
    %344 = vector.extract_strided_slice %340 {offsets = [0, 32], sizes = [8, 32], strides = [1, 1]} : vector<8x96xf32> to vector<8x32xf32>
    %345 = vector.extract_strided_slice %340 {offsets = [0, 64], sizes = [8, 32], strides = [1, 1]} : vector<8x96xf32> to vector<8x32xf32>
    %346 = arith.mulf %344, %319 : vector<8x32xf32>
    %347 = arith.mulf %343, %342 : vector<8x32xf32>
    %348 = arith.addf %346, %347 : vector<8x32xf32>
    %349 = math.tanh %348 : vector<8x32xf32>
    %350 = arith.mulf %345, %349 : vector<8x32xf32>
    %cst_157 = arith.constant 0.000000e+00 : f32
    %351 = vector.shape_cast %153 : vector<8x1xi1> to vector<8x1xi1>
    %352 = vector.broadcast %351 : vector<8x1xi1> to vector<8x32xi1>
    %353 = vector.broadcast %cst_157 : f32 to vector<8x32xf32>
    %354 = arith.select %352, %350, %353 : vector<8x32xi1>, vector<8x32xf32>
    %cst_158 = arith.constant dense<0.000000e+00> : vector<32xf32>
    %355 = vector.multi_reduction <add>, %354, %cst_158 [0] : vector<8x32xf32> to vector<32xf32>
    %356 = vector.shape_cast %355 : vector<32xf32> to vector<1x32xf32>
    %cst_159 = arith.constant 5.000000e-01 : f32
    %357 = vector.broadcast %cst_159 : f32 to vector<1x32xf32>
    %358 = arith.mulf %356, %357 : vector<1x32xf32>
    %359 = vector.extract_strided_slice %149 {offsets = [56, 0], sizes = [8, 128], strides = [1, 1]} : vector<64x128xf32> to vector<8x128xf32>
    %cst_160 = arith.constant dense<0.000000e+00> : vector<8x128xf32>
    %360 = tpu.matmul %350, %150, %cst_160 {dimension_numbers = #tpu.dot_dimension_numbers<[1], [0], [0], [1], [0, 0, 1, 1], [], []>} : vector<8x32xf32>, vector<32x128xf32>, vector<8x128xf32> -> vector<8x128xf32>
    %361 = arith.addf %359, %360 : vector<8x128xf32>
    %362 = vector.extract_strided_slice %361 {offsets = [0, 0], sizes = [8, 96], strides = [1, 1]} : vector<8x128xf32> to vector<8x96xf32>
    %cst_161 = arith.constant 5.000000e-01 : f32
    %363 = vector.broadcast %cst_161 : f32 to vector<8x96xf32>
    %364 = arith.mulf %363, %362 : vector<8x96xf32>
    %365 = math.tanh %364 : vector<8x96xf32>
    %cst_162 = arith.constant 5.000000e-01 : f32
    %366 = vector.broadcast %cst_162 : f32 to vector<8x96xf32>
    %367 = arith.mulf %366, %365 : vector<8x96xf32>
    %cst_163 = arith.constant 5.000000e-01 : f32
    %368 = vector.broadcast %cst_163 : f32 to vector<8x96xf32>
    %369 = arith.addf %367, %368 : vector<8x96xf32>
    %370 = vector.extract_strided_slice %361 {offsets = [0, 96], sizes = [8, 32], strides = [1, 1]} : vector<8x128xf32> to vector<8x32xf32>
    %371 = math.tanh %370 : vector<8x32xf32>
    %372 = vector.extract_strided_slice %369 {offsets = [0, 0], sizes = [8, 32], strides = [1, 1]} : vector<8x96xf32> to vector<8x32xf32>
    %373 = vector.extract_strided_slice %369 {offsets = [0, 32], sizes = [8, 32], strides = [1, 1]} : vector<8x96xf32> to vector<8x32xf32>
    %374 = vector.extract_strided_slice %369 {offsets = [0, 64], sizes = [8, 32], strides = [1, 1]} : vector<8x96xf32> to vector<8x32xf32>
    %375 = arith.mulf %373, %348 : vector<8x32xf32>
    %376 = arith.mulf %372, %371 : vector<8x32xf32>
    %377 = arith.addf %375, %376 : vector<8x32xf32>
    %378 = math.tanh %377 : vector<8x32xf32>
    %379 = arith.mulf %374, %378 : vector<8x32xf32>
    %cst_164 = arith.constant 0.000000e+00 : f32
    %380 = vector.shape_cast %153 : vector<8x1xi1> to vector<8x1xi1>
    %381 = vector.broadcast %380 : vector<8x1xi1> to vector<8x32xi1>
    %382 = vector.broadcast %cst_164 : f32 to vector<8x32xf32>
    %383 = arith.select %381, %379, %382 : vector<8x32xi1>, vector<8x32xf32>
    %cst_165 = arith.constant dense<0.000000e+00> : vector<32xf32>
    %384 = vector.multi_reduction <add>, %383, %cst_165 [0] : vector<8x32xf32> to vector<32xf32>
    %385 = vector.shape_cast %384 : vector<32xf32> to vector<1x32xf32>
    %cst_166 = arith.constant 5.000000e-01 : f32
    %386 = vector.broadcast %cst_166 : f32 to vector<1x32xf32>
    %387 = arith.mulf %385, %386 : vector<1x32xf32>
    %388 = tpu.concatenate %184, %213, %242, %271, %300, %329, %358, %387 in 0 : vector<1x32xf32>, vector<1x32xf32>, vector<1x32xf32>, vector<1x32xf32>, vector<1x32xf32>, vector<1x32xf32>, vector<1x32xf32>, vector<1x32xf32> -> vector<8x32xf32>
    %c0_167 = arith.constant 0 : index
    %c0_168 = arith.constant 0 : index
    %389 = vector.load %arg5[%c0_167, %c0_168] : memref<1x32xf32, #tpu.memory_space<vmem>>, vector<1x32xf32>
    %390 = vector.broadcast %389 : vector<1x32xf32> to vector<8x32xf32>
    %391 = arith.mulf %388, %390 : vector<8x32xf32>
    %cst_169 = arith.constant dense<0.000000e+00> : vector<8xf32>
    %392 = vector.multi_reduction <add>, %391, %cst_169 [1] : vector<8x32xf32> to vector<8xf32>
    %393 = vector.shape_cast %392 : vector<8xf32> to vector<8x1xf32>
    %c0_170 = arith.constant 0 : index
    %c0_171 = arith.constant 0 : index
    %394 = vector.load %arg6[%c0_170, %c0_171] : memref<1x1xf32, #tpu.memory_space<vmem>>, vector<1x1xf32>
    %395 = vector.broadcast %394 : vector<1x1xf32> to vector<8x1xf32>
    %396 = arith.addf %393, %395 : vector<8x1xf32>
    %397 = math.tanh %396 : vector<8x1xf32>
    %c0_172 = arith.constant 0 : index
    %c0_173 = arith.constant 0 : index
    %398 = vector.load %arg7[%c0_172, %c0_173] : memref<8x1xf32, #tpu.memory_space<vmem>>, vector<8x1xf32>
    tpu.vector_store %arg7[%c0_172, %c0_173], %397 {strides = array<i32>} : memref<8x1xf32, #tpu.memory_space<vmem>>, vector<8x1xf32>,
    return
  }
}

</mosaic_0001>

<bundles_post_ra>
// kernel: tpu_custom_call.1
= control target key start
LH: loop header
LB: loop body
LE: loop exit
PB: predicated region body
PF: predicated region fallthrough
CT: control target
= control target key end

     0   :  { %s2888_s0 = inlined_call_operand.vmem [shape: s32[16], index: 0, kind: input, shape index: {}]   ;;  %s2889_s1 = inlined_call_operand.vmem [shape: f32[1774,64], index: 1, kind: input, shape index: {}]   ;;  %s2890_s2 = inlined_call_operand.vmem [shape: f32[64,128], index: 2, kind: input, shape index: {}]   ;;  %s2891_s3 = inlined_call_operand.vmem [shape: f32[32,128], index: 3, kind: input, shape index: {}]   ;;  %s2892_s4 = inlined_call_operand.vmem [shape: f32[1,128], index: 4, kind: input, shape index: {}]   ;;  %s2893_s5 = inlined_call_operand.vmem [shape: f32[1,32], index: 5, kind: input, shape index: {}]   ;;  %s2894_s6 = inlined_call_operand.<no memory space> [shape: f32[1,1], index: 6, kind: input, shape index: {}]   ;;  %s2895_s7 = inlined_call_operand.vmem [shape: f32[8,1], index: 7, kind: output, shape index: {}]  }
   0x1   :  { %v12_v0 = vstv %s2894_s6 }
   0x2   :  { %13 = vst [vmem:[#allocation4] sm:$0x1] %v12_v0 }
   0x3   :  { %14 = vsyncpa [#allocation6], 0  ;;  %s21_s28 = sshll.u32 %s2888_s0, 4  ;;  %s22_s28 = int_to_ptr.vmem [resolvable:$true] %s21_s28 }
   0x4   :  { %s2546_s29 = scalar_lea.vmem %s22_s28, 16  ;;  %p2551_p1 = scmp.lt.s32.totalorder %s22_s28, %s22_s28 }
   0x5   :  { %p2547_p0 = scmp.ne.s32.totalorder %s22_s28, %s2546_s29  ;;  %p2552_p2 = scmp.lt.s32.totalorder %s2546_s29, %s2546_s29 }
   0x7   :  { %p2553_p3 = por %p2552_p2, %p2551_p1 }
   0x9   :  { %p2554_p4 = pnand %p2553_p3, %p2547_p0 }
   0xb   :  { %2557 = shalt.err (!%p2554_p4)
}
   0xc   :  { %s2592_s30 = smov [#allocation5]  }
   0xd   :  { %24 = dma.vmem_to_smem %s22_s28, 16, %s2592_s30, [#allocation6]  }
   0xe   :  { %2558 = dma.done.wait [#allocation6], 16  }
   0xf   :  { %2559 = vsyncadd [#allocation6], 4294967280 }
  0x10   :  { %38 = sfence }
  0x11   :  { %s39_s6 = sld [smem:[#allocation5]] }
  0x17   :  { %s40_s10 = scalar_lea.vmem %s2889_s1, %s39_s6 }
  0x18   :  { %v58_v1 = vld [vmem:[%s40_s10] sm:$0x1] }
  0x19   :  { %59 = vst [vmem:[#allocation2] sm:$0x1] %v58_v1 }
  0x1a   :  { %84 = vsyncadd [#allocation3], 16  ;;  %s2205_s0 = sld [smem:[#allocation5 + $0x1]] }
  0x20   :  { %s86_s13 = scalar_lea.vmem %s2889_s1, %s2205_s0 }
  0x21   :  { %v106_v2 = vld [vmem:[%s86_s13] sm:$0x1] }
  0x22   :  { %107 = vst [vmem:[#allocation2 + $0x1] sm:$0x1] %v106_v2 }
  0x23   :  { %132 = vsyncadd [#allocation3 + $0x1], 16  ;;  %s2206_s14 = sld [smem:[#allocation5 + $0x2]] }
  0x29   :  { %s134_s17 = scalar_lea.vmem %s2889_s1, %s2206_s14 }
  0x2a   :  { %v154_v3 = vld [vmem:[%s134_s17] sm:$0x1] }
  0x2b   :  { %155 = vst [vmem:[#allocation2 + $0x8] sm:$0x1] %v154_v3 }
  0x2c   :  { %180 = vsyncadd [#allocation3 + $0x2], 16  ;;  %s2207_s18 = sld [smem:[#allocation5 + $0x3]] }
  0x32   :  { %s182_s21 = scalar_lea.vmem %s2889_s1, %s2207_s18 }
  0x33   :  { %v202_v4 = vld [vmem:[%s182_s21] sm:$0x1] }
  0x34   :  { %203 = vst [vmem:[#allocation2 + $0x9] sm:$0x1] %v202_v4 }
  0x35   :  { %228 = vsyncadd [#allocation3 + $0x3], 16  ;;  %s2208_s22 = sld [smem:[#allocation5 + $0x4]] }
  0x3b   :  { %s230_s25 = scalar_lea.vmem %s2889_s1, %s2208_s22 }
  0x3c   :  { %v250_v5 = vld [vmem:[%s230_s25] sm:$0x1] }
  0x3d   :  { %251 = vst [vmem:[#allocation2 + $0x10] sm:$0x1] %v250_v5 }
  0x3e   :  { %276 = vsyncadd [#allocation3 + $0x4], 16  ;;  %s2209_s26 = sld [smem:[#allocation5 + $0x5]] }
  0x44   :  { %s278_s29 = scalar_lea.vmem %s2889_s1, %s2209_s26 }
  0x45   :  { %v298_v6 = vld [vmem:[%s278_s29] sm:$0x1] }
  0x46   :  { %299 = vst [vmem:[#allocation2 + $0x11] sm:$0x1] %v298_v6 }
  0x47   :  { %324 = vsyncadd [#allocation3 + $0x5], 16  ;;  %s2210_s30 = sld [smem:[#allocation5 + $0x6]] }
  0x4d   :  { %s326_s9 = scalar_lea.vmem %s2889_s1, %s2210_s30 }
  0x4e   :  { %v346_v7 = vld [vmem:[%s326_s9] sm:$0x1] }
  0x4f   :  { %347 = vst [vmem:[#allocation2 + $0x18] sm:$0x1] %v346_v7 }
  0x50   :  { %372 = vsyncadd [#allocation3 + $0x6], 16  ;;  %s2211_s10 = sld [smem:[#allocation5 + $0x7]] }
  0x56   :  { %s374_s12 = scalar_lea.vmem %s2889_s1, %s2211_s10 }
  0x57   :  { %v394_v8 = vld [vmem:[%s374_s12] sm:$0x1] }
  0x58   :  { %395 = vst [vmem:[#allocation2 + $0x19] sm:$0x1] %v394_v8 }
  0x59   :  { %420 = vsyncadd [#allocation3 + $0x7], 16  ;;  %s2212_s13 = sld [smem:[#allocation5 + $0x8]] }
  0x5f   :  { %s422_s16 = scalar_lea.vmem %s2889_s1, %s2212_s13 }
  0x60   :  { %v442_v9 = vld [vmem:[%s422_s16] sm:$0x1] }
  0x61   :  { %443 = vst [vmem:[#allocation2 + $0x20] sm:$0x1] %v442_v9 }
  0x62   :  { %468 = vsyncadd [#allocation3 + $0x8], 16  ;;  %s2213_s17 = sld [smem:[#allocation5 + $0x9]] }
  0x68   :  { %s470_s20 = scalar_lea.vmem %s2889_s1, %s2213_s17 }
  0x69   :  { %v490_v10 = vld [vmem:[%s470_s20] sm:$0x1] }
  0x6a   :  { %491 = vst [vmem:[#allocation2 + $0x21] sm:$0x1] %v490_v10 }
  0x6b   :  { %516 = vsyncadd [#allocation3 + $0x9], 16  ;;  %s2214_s21 = sld [smem:[#allocation5 + $0xa]] }
  0x71   :  { %s518_s24 = scalar_lea.vmem %s2889_s1, %s2214_s21 }
  0x72   :  { %v538_v11 = vld [vmem:[%s518_s24] sm:$0x1] }
  0x73   :  { %539 = vst [vmem:[#allocation2 + $0x28] sm:$0x1] %v538_v11 }
  0x74   :  { %564 = vsyncadd [#allocation3 + $0xa], 16  ;;  %s2215_s25 = sld [smem:[#allocation5 + $0xb]] }
  0x7a   :  { %s566_s28 = scalar_lea.vmem %s2889_s1, %s2215_s25 }
  0x7b   :  { %v586_v12 = vld [vmem:[%s566_s28] sm:$0x1] }
  0x7c   :  { %587 = vst [vmem:[#allocation2 + $0x29] sm:$0x1] %v586_v12 }
  0x7d   :  { %612 = vsyncadd [#allocation3 + $0xb], 16  ;;  %s2216_s29 = sld [smem:[#allocation5 + $0xc]] }
  0x83   :  { %s614_s8 = scalar_lea.vmem %s2889_s1, %s2216_s29 }
  0x84   :  { %v634_v13 = vld [vmem:[%s614_s8] sm:$0x1] }
  0x85   :  { %635 = vst [vmem:[#allocation2 + $0x30] sm:$0x1] %v634_v13 }
  0x86   :  { %660 = vsyncadd [#allocation3 + $0xc], 16  ;;  %s2217_s9 = sld [smem:[#allocation5 + $0xd]] }
  0x8c   :  { %s662_s11 = scalar_lea.vmem %s2889_s1, %s2217_s9 }
  0x8d   :  { %v682_v14 = vld [vmem:[%s662_s11] sm:$0x1] }
  0x8e   :  { %683 = vst [vmem:[#allocation2 + $0x31] sm:$0x1] %v682_v14 }
  0x8f   :  { %708 = vsyncadd [#allocation3 + $0xd], 16  ;;  %s2218_s12 = sld [smem:[#allocation5 + $0xe]] }
  0x95   :  { %s710_s15 = scalar_lea.vmem %s2889_s1, %s2218_s12 }
  0x96   :  { %v730_v15 = vld [vmem:[%s710_s15] sm:$0x1] }
  0x97   :  { %731 = vst [vmem:[#allocation2 + $0x38] sm:$0x1] %v730_v15 }
  0x98   :  { %756 = vsyncadd [#allocation3 + $0xe], 16  ;;  %s2219_s16 = sld [smem:[#allocation5 + $0xf]] }
  0x9e   :  { %s758_s19 = scalar_lea.vmem %s2889_s1, %s2219_s16 }
  0x9f   :  { %v778_v16 = vld [vmem:[%s758_s19] sm:$0x1] }
  0xa0   :  { %779 = vst [vmem:[#allocation2 + $0x39] sm:$0x1] %v778_v16 }
  0xa1   :  { %804 = vsyncadd [#allocation3 + $0xf], 16 }
  0xa2   :  { %2560 = dma.done.wait [#allocation3], 16 }
  0xa3   :  { %2561 = vsyncadd [#allocation3], 4294967280 }
  0xa4   :  { %2562 = dma.done.wait [#allocation3 + $0x1], 16 }
  0xa5   :  { %2563 = vsyncadd [#allocation3 + $0x1], 4294967280 }
  0xa6   :  { %2564 = dma.done.wait [#allocation3 + $0x2], 16 }
  0xa7   :  { %2565 = vsyncadd [#allocation3 + $0x2], 4294967280 }
  0xa8   :  { %2566 = dma.done.wait [#allocation3 + $0x3], 16 }
  0xa9   :  { %2567 = vsyncadd [#allocation3 + $0x3], 4294967280 }
  0xaa   :  { %2568 = dma.done.wait [#allocation3 + $0x4], 16 }
  0xab   :  { %2569 = vsyncadd [#allocation3 + $0x4], 4294967280 }
  0xac   :  { %2570 = dma.done.wait [#allocation3 + $0x5], 16 }
  0xad   :  { %2571 = vsyncadd [#allocation3 + $0x5], 4294967280 }
  0xae   :  { %2572 = dma.done.wait [#allocation3 + $0x6], 16 }
  0xaf   :  { %2573 = vsyncadd [#allocation3 + $0x6], 4294967280 }
  0xb0   :  { %2574 = dma.done.wait [#allocation3 + $0x7], 16 }
  0xb1   :  { %2575 = vsyncadd [#allocation3 + $0x7], 4294967280 }
  0xb2   :  { %2576 = dma.done.wait [#allocation3 + $0x8], 16 }
  0xb3   :  { %2577 = vsyncadd [#allocation3 + $0x8], 4294967280 }
  0xb4   :  { %2578 = dma.done.wait [#allocation3 + $0x9], 16 }
  0xb5   :  { %2579 = vsyncadd [#allocation3 + $0x9], 4294967280 }
  0xb6   :  { %2580 = dma.done.wait [#allocation3 + $0xa], 16 }
  0xb7   :  { %2581 = vsyncadd [#allocation3 + $0xa], 4294967280 }
  0xb8   :  { %2582 = dma.done.wait [#allocation3 + $0xb], 16 }
  0xb9   :  { %2583 = vsyncadd [#allocation3 + $0xb], 4294967280 }
  0xba   :  { %2584 = dma.done.wait [#allocation3 + $0xc], 16 }
  0xbb   :  { %2585 = vsyncadd [#allocation3 + $0xc], 4294967280 }
  0xbc   :  { %2586 = dma.done.wait [#allocation3 + $0xd], 16 }
  0xbd   :  { %2587 = vsyncadd [#allocation3 + $0xd], 4294967280 }
  0xbe   :  { %2588 = dma.done.wait [#allocation3 + $0xe], 16 }
  0xbf   :  { %2589 = vsyncadd [#allocation3 + $0xe], 4294967280 }
  0xc0   :  { %2590 = dma.done.wait [#allocation3 + $0xf], 16 }
  0xc1   :  { %2591 = vsyncadd [#allocation3 + $0xf], 4294967280  ;;  %v2593_v17 = vmov 0.0|0.0   ;;  %vm2594_vm0 = vmmov 0   ;;  %v2595_v18 = vmov 0.0   ;;  %v846_v19 = vld [vmem:[%s2890_s2] sm:$0xff]  ;;  %v995_v13 = vlaneseq }
  0xc2   :  { %2442 = vmatprep.subr.bf16.mxu1 %v2593_v17  ;;  %2346 = vmatprep.mubr.msk.f32.mxu1 %vm2594_vm0, %v2595_v18  ;;  %v847_v20 = vld [vmem:[%s2890_s2 + $0x8] sm:$0xff]  ;;  %v848_v21 = vld [vmem:[%s2890_s2 + $0x10] sm:$0xff]  ;;  %v849_v23 = vld [vmem:[%s2890_s2 + $0x18] sm:$0xff]  ;;  %vm861_vm1 = vcmask 523264   ;;  %s2596_s18 = smov 32   ;;  %vm998_vm2 = vcmask 261120  }
  0xc3   :  { %v2426_v22 = vpack.c.bf16 %v847_v20, %v846_v19  ;;  %v850_v24 = vld [vmem:[%s2890_s2 + $0x20] sm:$0xff]  ;;  %v2430_v25 = vpack.c.bf16 %v849_v23, %v848_v21  ;;  %v851_v26 = vld [vmem:[%s2890_s2 + $0x28] sm:$0xff]  ;;  %v993_v31 = vld [vmem:[%s2891_s3 + $0x10] sm:$0xff]  ;;  %v2776_v14 = vshrl.u32 %v995_v13, 7  ;;  %vm1098_vm4 = vcmask 785920  }
  0xc4   :  { %v991_v27 = vld [vmem:[%s2891_s3] sm:$0xff]  ;;  %v992_v28 = vld [vmem:[%s2891_s3 + $0x8] sm:$0xff]  ;;  %v994_v32 = vld [vmem:[%s2891_s3 + $0x18] sm:$0xff]  ;;  %v2434_v33 = vpack.c.bf16 %v851_v26, %v850_v24  ;;  %vm1856_vm5 = vcmask 1040384   ;;  %vm1858_vm6 = vcmask 1041408   ;;  %vm1860_vm7 = vcmask 1042432  }
  0xc5   :  { %2427 = vmatprep.subr.bf16.mxu0 %v2426_v22  ;;  %v2719_v29 = vpack.c.bf16 %v992_v28, %v991_v27  ;;  %v838_v30 = vld [vmem:[#allocation2] sm:$0xff]  ;;  %v2729_v34 = vpack.c.bf16 %v994_v32, %v993_v31  ;;  %v852_v35 = vld [vmem:[%s2890_s2 + $0x30] sm:$0xff]  ;;  %v853_v36 = vld [vmem:[%s2890_s2 + $0x38] sm:$0xff]  ;;  %vm997_vm3 = vcmp.lt.s32.totalorder %v2776_v14, 2  ;;  %vm1862_vm8 = vcmask 1043456  }
  0xc6   :  { %2429 = vmatpush3.bf16.msra.mxu0 %v2426_v22  ;;  %2326 = vmatprep.mubr.msk.f32.mxu0 %vm861_vm1, %v838_v30  ;;  %v2438_v37 = vpack.c.bf16 %v853_v36, %v852_v35  ;;  %v839_v38 = vld [vmem:[#allocation2 + $0x8] sm:$0xff]  ;;  %v2756_v41 = vld [vmem:[%s2892_s4] ss:$0 sm:$0xff]  ;;  %s2597_s4 = smov 64   ;;  %v840_v11 = vld [vmem:[#allocation2 + $0x10] sm:$0xff]  ;;  %vm1864_vm9 = vcmask 1044480  }
  0xc7   :  { %2431 = vmatprep.subr.bf16.mxu0 %v2430_v25  ;;  %2444 = vmatpush3.bf16.msra.mxu1 %v2719_v29  ;;  %v841_v12 = vld [vmem:[#allocation2 + $0x18] sm:$0xff]  ;;  %vm1866_vm10 = vcmask 1045504   ;;  %vm1868_vm11 = vcmask 1046528   ;;  %v2237_v14 = vld [vmem:[#allocation4] ss:$0 sm:$0xff]  ;;  %vm1896_vm12 = vcmask 7168  }
  0xc8   :  { %2445 = vmatprep.subr.bf16.mxu1 %v2593_v17 }
  0xca   :  { %2433 = vmatpush3.bf16.msra.mxu0 %v2430_v25 }
  0xcb   :  { %2435 = vmatprep.subr.bf16.mxu0 %v2434_v33  ;;  %2447 = vmatpush3.bf16.msra.mxu1 %v2729_v34 }
  0xcc   :  { %2448 = vmatprep.subr.bf16.mxu1 %v2593_v17 }
  0xce   :  { %2437 = vmatpush3.bf16.msra.mxu0 %v2434_v33  ;;  %2347 = vmatmul.mubr.f32.vlgmr.msra.gmra.mrb[0].mxu1 %v2595_v18 }
  0xcf   :  { %2439 = vmatprep.subr.bf16.mxu0 %v2438_v37  ;;  %2450 = vmatpush3.bf16.msra.mxu1 %v2719_v29 }
  0xd0   :  { %2451 = vmatprep.subr.bf16.mxu1 %v2593_v17  ;;  %2357 = vmatprep.mubr.msk.f32.mxu1 %vm2594_vm0, %v2595_v18 }
  0xd2   :  { %2441 = vmatpush3.bf16.msra.mxu0 %v2438_v37 }
  0xd3   :  { %2453 = vmatpush3.bf16.msra.mxu1 %v2729_v34  ;;  %2460 = vmatprep.subr.bf16.mxu0 %v2593_v17 }
  0xd4   :  { %2454 = vmatprep.subr.bf16.mxu1 %v2593_v17 }
  0xd5   :  { %2327 = vmatmul.mubr.msk.f32.vlgmr.msra.gmra.mrb[0].mxu0 %vm861_vm1, %v839_v38 }
  0xd6   :  { %2462 = vmatpush3.bf16.msra.mxu0 %v2719_v29  ;;  %2329 = vmatprep.mubr.msk.f32.mxu0 %vm861_vm1, %v840_v11 }
  0xd7   :  { %2463 = vmatprep.subr.bf16.mxu0 %v2593_v17 }
  0xd9   :  { %2330 = vmatmul.mubr.msk.f32.gmra.mrb[2].mxu0 %vm861_vm1, %v841_v12 }
  0xda   :  { %2465 = vmatpush3.bf16.msra.mxu0 %v2729_v34 }
  0xdb   :  { %2472 = vmatprep.subr.bf16.mxu0 %v2593_v17 }
 0x1a1   :  { %v1068_v39 = vpop.f32.mrb[0].mxu1 }
 0x1a2   :  { %v2348_v40 = vpop.f32.mrb[1].mxu1 }
 0x1a8   :  { %v2328_v42 = vpop.f32.mrb[0].mxu0 }
 0x1a9   :  { %v952_v43 = vpop.f32.mrb[1].mxu0  ;;  %v958_v60 = vadd.f32 %v2328_v42, %v2756_v41 }
 0x1aa   :  { %v953_v44 = vadd.f32 %v2756_v41, %v952_v43 }
 0x1ac   :  { %v1072_v45 = vadd.f32 %v1068_v39, %v953_v44  ;;  %v2786_v40 = vpop.f32.mrb[2].mxu0 }
 0x1ad   :  { %v962_v42 = vpop.f32.mrb[3].mxu0 }
 0x1ae   :  { %2496 = vtanh.f32 %v1072_v45  ;;  %v1073_v47 = vmul.f32 0.5, %v1072_v45  ;;  %v963_v44 = vadd.f32 %v2756_v41, %v962_v42 }
 0x1b0   :  { %2498 = vtanh.f32 %v1073_v47 }
 0x1b8   :  { %v2497_v46 = vpop.eup %2496 }
 0x1b9   :  { %1080 = vrot.lane.b32.xlu0 %v2497_v46, %s2596_s18 }
 0x1ba   :  { %v2499_v48 = vpop.eup %2498 }
 0x1bb   :  { %v1075_v49 = vmul.f32 0.5, %v2499_v48 }
 0x1bd   :  { %v1076_v50 = vadd.f32 0.5, %v1075_v49 }
 0x1bf   :  { %v1078_v53 = vmul.f32 0.0, %v1076_v50 }
 0x22b   :  { %v1081_v51 = vpop.permute.xlu0 %1080 }
 0x22c   :  { %v1083_v52 = vmul.f32 %v1081_v51, %v1076_v50 }
 0x22e   :  { %1085 = vrot.lane.b32.xlu0 %v1083_v52, %s2596_s18 }
 0x2a0   :  { %v1086_v54 = vpop.permute.xlu0 %1085 }
 0x2a1   :  { %v1088_v55 = vadd.f32 %v1086_v54, %v1078_v53 }
 0x2a3   :  { %2500 = vtanh.f32 %v1088_v55 }
 0x2ad   :  { %v2501_v56 = vpop.eup %2500 }
 0x2ae   :  { %1091 = vrot.lane.b32.xlu1 %v2501_v56, %s2596_s18 }
 0x320   :  { %v1092_v57 = vpop.permute.xlu1 %1091 }
 0x321   :  { %v1094_v58 = vmul.f32 %v1092_v57, %v1076_v50 }
 0x323   :  { %1108 = vrot.lane.b32.xlu1 %v1094_v58, %s2597_s4  ;;  %v1097_v15 = vsel %vm997_vm3, %v1094_v58, 0.0 }
 0x324   :  { %v1099_v16 = vsel %vm1098_vm4, %v1097_v15, 0.0 }
 0x325   :  { %v1100_v19 = vrot.slane %v1099_v16, 4 }
 0x327   :  { %v1101_v20 = vadd.f32 %v1100_v19, %v1099_v16  ;;  %v968_v19 = vadd.f32 %v2786_v40, %v2756_v41 }
 0x329   :  { %v1102_v22 = vrot.slane %v1101_v20, 2 }
 0x32b   :  { %v1103_v26 = vadd.f32 %v1102_v22, %v1101_v20 }
 0x32d   :  { %v1104_v30 = vrot.slane %v1103_v26, 1 }
 0x32f   :  { %v1105_v33 = vadd.f32 %v1104_v30, %v1103_v26 }
 0x331   :  { %v1106_v37 = vmul.f32 0.5, %v1105_v33 }
 0x395   :  { %v1109_v59 = vpop.permute.xlu1 %1108 }
 0x396   :  { %2358 = vmatmul.mubr.msk.f32.vlgmr.msra.gmra.mrb[2].mxu1 %vm998_vm2, %v1109_v59  ;;  %v842_v59 = vld [vmem:[#allocation2 + $0x20] sm:$0xff] }
 0x397   :  { %2456 = vmatpush3.bf16.msra.mxu1 %v2719_v29  ;;  %2368 = vmatprep.mubr.msk.f32.mxu1 %vm2594_vm0, %v2595_v18 }
 0x398   :  { %2457 = vmatprep.subr.bf16.mxu1 %v2593_v17  ;;  %2332 = vmatprep.mubr.msk.f32.mxu0 %vm861_vm1, %v842_v59 }
 0x39b   :  { %2459 = vmatpush3.bf16.msra.mxu1 %v2729_v34 }
 0x39c   :  { %2466 = vmatprep.subr.bf16.mxu1 %v2593_v17 }
 0x469   :  { %v1178_v61 = vpop.f32.mrb[2].mxu1 }
 0x46a   :  { %v1182_v62 = vadd.f32 %v1178_v61, %v958_v60  ;;  %v2359_v63 = vpop.f32.mrb[3].mxu1  ;;  %v843_v60 = vld [vmem:[#allocation2 + $0x28] sm:$0xff]  ;;  %v844_v61 = vld [vmem:[#allocation2 + $0x30] sm:$0xff] }
 0x46b   :  { %2333 = vmatmul.mubr.msk.f32.gmra.mrb[4].mxu0 %vm861_vm1, %v843_v60 }
 0x46c   :  { %2502 = vtanh.f32 %v1182_v62  ;;  %v1183_v1 = vmul.f32 0.5, %v1182_v62  ;;  %2335 = vmatprep.mubr.msk.f32.mxu0 %vm861_vm1, %v844_v61  ;;  %v845_v62 = vld [vmem:[#allocation2 + $0x38] sm:$0xff] }
 0x46e   :  { %2504 = vtanh.f32 %v1183_v1 }
 0x46f   :  { %2336 = vmatmul.mubr.msk.f32.gmra.mrb[6].mxu0 %vm861_vm1, %v845_v62 }
 0x470   :  { %2379 = vmatprep.mubr.msk.f32.mxu0 %vm2594_vm0, %v2595_v18 }
 0x476   :  { %v2503_v0 = vpop.eup %2502 }
 0x477   :  { %1190 = vrot.lane.b32.xlu0 %v2503_v0, %s2596_s18 }
 0x478   :  { %v2505_v2 = vpop.eup %2504 }
 0x479   :  { %v1185_v3 = vmul.f32 0.5, %v2505_v2 }
 0x47b   :  { %v1186_v4 = vadd.f32 0.5, %v1185_v3 }
 0x47d   :  { %v1188_v7 = vmul.f32 %v1186_v4, %v1088_v55 }
 0x4e9   :  { %v1191_v5 = vpop.permute.xlu0 %1190 }
 0x4ea   :  { %v1193_v6 = vmul.f32 %v1191_v5, %v1186_v4 }
 0x4ec   :  { %1195 = vrot.lane.b32.xlu1 %v1193_v6, %s2596_s18 }
 0x53e   :  { %v2809_v11 = vpop.f32.mrb[4].mxu0 }
 0x53f   :  { %v972_v12 = vpop.f32.mrb[5].mxu0 }
 0x542   :  { %v2811_v13 = vpop.f32.mrb[6].mxu0 }
 0x543   :  { %v2813_v15 = vpop.f32.mrb[7].mxu0 }
 0x55e   :  { %v1196_v8 = vpop.permute.xlu1 %1195 }
 0x55f   :  { %v1198_v9 = vadd.f32 %v1196_v8, %v1188_v7 }
 0x561   :  { %2506 = vtanh.f32 %v1198_v9 }
 0x56b   :  { %v2507_v10 = vpop.eup %2506 }
 0x56c   :  { %1201 = vrot.lane.b32.xlu0 %v2507_v10, %s2596_s18 }
 0x5de   :  { %v1202_v21 = vpop.permute.xlu0 %1201 }
 0x5df   :  { %v1204_v23 = vmul.f32 %v1202_v21, %v1186_v4 }
 0x5e1   :  { %v1205_v24 = vsel %vm997_vm3, %v1204_v23, 0.0  ;;  %1215 = vrot.lane.b32.xlu1 %v1204_v23, %s2597_s4 }
 0x5e2   :  { %v1206_v25 = vsel %vm1098_vm4, %v1205_v24, 0.0 }
 0x5e3   :  { %v1207_v27 = vrot.slane %v1206_v25, 4 }
 0x5e5   :  { %v1208_v28 = vadd.f32 %v1207_v27, %v1206_v25 }
 0x5e7   :  { %v1209_v31 = vrot.slane %v1208_v28, 2 }
 0x5e9   :  { %v1210_v32 = vadd.f32 %v1209_v31, %v1208_v28 }
 0x5eb   :  { %v1211_v35 = vrot.slane %v1210_v32, 1 }
 0x5ed   :  { %v1212_v36 = vadd.f32 %v1211_v35, %v1210_v32 }
 0x5ef   :  { %v1213_v38 = vmul.f32 0.5, %v1212_v36 }
 0x5f1   :  { %v1857_v39 = vsel %vm1856_vm5, %v1106_v37, %v1213_v38 }
 0x653   :  { %v1216_v43 = vpop.permute.xlu1 %1215 }
 0x654   :  { %2369 = vmatmul.mubr.msk.f32.vlgmr.msra.gmra.mrb[4].mxu1 %vm998_vm2, %v1216_v43 }
 0x655   :  { %2468 = vmatpush3.bf16.msra.mxu1 %v2719_v29  ;;  %2390 = vmatprep.mubr.msk.f32.mxu1 %vm2594_vm0, %v2595_v18 }
 0x656   :  { %2469 = vmatprep.subr.bf16.mxu1 %v2593_v17 }
 0x659   :  { %2471 = vmatpush3.bf16.msra.mxu1 %v2729_v34 }
 0x65a   :  { %2478 = vmatprep.subr.bf16.mxu1 %v2593_v17 }
 0x727   :  { %v1285_v45 = vpop.f32.mrb[4].mxu1 }
 0x728   :  { %v1289_v46 = vadd.f32 %v1285_v45, %v963_v44  ;;  %v2370_v47 = vpop.f32.mrb[5].mxu1 }
 0x72a   :  { %2508 = vtanh.f32 %v1289_v46  ;;  %v1290_v49 = vmul.f32 0.5, %v1289_v46 }
 0x72c   :  { %2510 = vtanh.f32 %v1290_v49 }
 0x734   :  { %v2509_v48 = vpop.eup %2508 }
 0x735   :  { %1297 = vrot.lane.b32.xlu0 %v2509_v48, %s2596_s18 }
 0x736   :  { %v2511_v50 = vpop.eup %2510 }
 0x737   :  { %v1292_v51 = vmul.f32 0.5, %v2511_v50  ;;  %v973_v50 = vadd.f32 %v2756_v41, %v972_v12 }
 0x739   :  { %v1293_v52 = vadd.f32 0.5, %v1292_v51 }
 0x73b   :  { %v1295_v55 = vmul.f32 %v1293_v52, %v1198_v9 }
 0x7a7   :  { %v1298_v53 = vpop.permute.xlu0 %1297 }
 0x7a8   :  { %v1300_v54 = vmul.f32 %v1298_v53, %v1293_v52 }
 0x7aa   :  { %1302 = vrot.lane.b32.xlu1 %v1300_v54, %s2596_s18 }
 0x81c   :  { %v1303_v56 = vpop.permute.xlu1 %1302 }
 0x81d   :  { %v1305_v57 = vadd.f32 %v1303_v56, %v1295_v55 }
 0x81f   :  { %2512 = vtanh.f32 %v1305_v57 }
 0x829   :  { %v2513_v58 = vpop.eup %2512 }
 0x82a   :  { %1308 = vrot.lane.b32.xlu0 %v2513_v58, %s2596_s18 }
 0x89c   :  { %v1309_v63 = vpop.permute.xlu0 %1308 }
 0x89d   :  { %v1311_v0 = vmul.f32 %v1309_v63, %v1293_v52 }
 0x89f   :  { %v1312_v1 = vsel %vm997_vm3, %v1311_v0, 0.0  ;;  %1322 = vrot.lane.b32.xlu1 %v1311_v0, %s2597_s4 }
 0x8a0   :  { %v1313_v2 = vsel %vm1098_vm4, %v1312_v1, 0.0 }
 0x8a1   :  { %v1314_v3 = vrot.slane %v1313_v2, 4 }
 0x8a3   :  { %v1315_v4 = vadd.f32 %v1314_v3, %v1313_v2 }
 0x8a5   :  { %v1316_v5 = vrot.slane %v1315_v4, 2 }
 0x8a7   :  { %v1317_v6 = vadd.f32 %v1316_v5, %v1315_v4 }
 0x8a9   :  { %v1318_v7 = vrot.slane %v1317_v6, 1 }
 0x8ab   :  { %v1319_v8 = vadd.f32 %v1318_v7, %v1317_v6 }
 0x8ad   :  { %v1320_v9 = vmul.f32 0.5, %v1319_v8 }
 0x8af   :  { %v1859_v10 = vsel %vm1858_vm6, %v1857_v39, %v1320_v9 }
 0x911   :  { %v1323_v16 = vpop.permute.xlu1 %1322 }
 0x912   :  { %2380 = vmatmul.mubr.msk.f32.vlgmr.msra.gmra.mrb[8].mxu0 %vm998_vm2, %v1323_v16 }
 0x913   :  { %2474 = vmatpush3.bf16.msra.mxu0 %v2719_v29  ;;  %2401 = vmatprep.mubr.msk.f32.mxu0 %vm2594_vm0, %v2595_v18 }
 0x914   :  { %2475 = vmatprep.subr.bf16.mxu0 %v2593_v17 }
 0x917   :  { %2477 = vmatpush3.bf16.msra.mxu0 %v2729_v34 }
 0x918   :  { %2484 = vmatprep.subr.bf16.mxu0 %v2593_v17 }
 0x9e5   :  { %v1392_v20 = vpop.f32.mrb[8].mxu0 }
 0x9e6   :  { %v1396_v21 = vadd.f32 %v1392_v20, %v968_v19  ;;  %v2381_v22 = vpop.f32.mrb[9].mxu0  ;;  %v978_v20 = vadd.f32 %v2809_v11, %v2756_v41 }
 0x9e8   :  { %2514 = vtanh.f32 %v1396_v21  ;;  %v1397_v24 = vmul.f32 0.5, %v1396_v21 }
 0x9ea   :  { %2516 = vtanh.f32 %v1397_v24 }
 0x9f2   :  { %v2515_v23 = vpop.eup %2514 }
 0x9f3   :  { %1404 = vrot.lane.b32.xlu0 %v2515_v23, %s2596_s18 }
 0x9f4   :  { %v2517_v25 = vpop.eup %2516 }
 0x9f5   :  { %v1399_v26 = vmul.f32 0.5, %v2517_v25 }
 0x9f7   :  { %v1400_v27 = vadd.f32 0.5, %v1399_v26 }
 0x9f9   :  { %v1402_v31 = vmul.f32 %v1400_v27, %v1305_v57 }
 0xa65   :  { %v1405_v28 = vpop.permute.xlu0 %1404 }
 0xa66   :  { %v1407_v30 = vmul.f32 %v1405_v28, %v1400_v27 }
 0xa68   :  { %1409 = vrot.lane.b32.xlu1 %v1407_v30, %s2596_s18 }
 0xada   :  { %v1410_v32 = vpop.permute.xlu1 %1409 }
 0xadb   :  { %v1412_v33 = vadd.f32 %v1410_v32, %v1402_v31 }
 0xadd   :  { %2518 = vtanh.f32 %v1412_v33 }
 0xae7   :  { %v2519_v35 = vpop.eup %2518 }
 0xae8   :  { %1415 = vrot.lane.b32.xlu0 %v2519_v35, %s2596_s18 }
 0xb5a   :  { %v1416_v36 = vpop.permute.xlu0 %1415 }
 0xb5b   :  { %v1418_v37 = vmul.f32 %v1416_v36, %v1400_v27 }
 0xb5d   :  { %v1419_v38 = vsel %vm997_vm3, %v1418_v37, 0.0  ;;  %1429 = vrot.lane.b32.xlu1 %v1418_v37, %s2597_s4 }
 0xb5e   :  { %v1420_v39 = vsel %vm1098_vm4, %v1419_v38, 0.0 }
 0xb5f   :  { %v1421_v40 = vrot.slane %v1420_v39, 4 }
 0xb61   :  { %v1422_v42 = vadd.f32 %v1421_v40, %v1420_v39 }
 0xb63   :  { %v1423_v43 = vrot.slane %v1422_v42, 2 }
 0xb65   :  { %v1424_v44 = vadd.f32 %v1423_v43, %v1422_v42 }
 0xb67   :  { %v1425_v45 = vrot.slane %v1424_v44, 1 }
 0xb69   :  { %v1426_v46 = vadd.f32 %v1425_v45, %v1424_v44 }
 0xb6b   :  { %v1427_v47 = vmul.f32 0.5, %v1426_v46  ;;  %v983_v46 = vadd.f32 %v2756_v41, %v2813_v15 }
 0xb6d   :  { %v1861_v48 = vsel %vm1860_vm7, %v1859_v10, %v1427_v47 }
 0xbcf   :  { %v1430_v49 = vpop.permute.xlu1 %1429 }
 0xbd0   :  { %2391 = vmatmul.mubr.msk.f32.vlgmr.msra.gmra.mrb[6].mxu1 %vm998_vm2, %v1430_v49 }
 0xbd1   :  { %2480 = vmatpush3.bf16.msra.mxu1 %v2719_v29  ;;  %2412 = vmatprep.mubr.msk.f32.mxu1 %vm2594_vm0, %v2595_v18 }
 0xbd2   :  { %2481 = vmatprep.subr.bf16.mxu1 %v2593_v17 }
 0xbd5   :  { %2483 = vmatpush3.bf16.msra.mxu1 %v2729_v34 }
 0xca3   :  { %v1499_v51 = vpop.f32.mrb[6].mxu1 }
 0xca4   :  { %v1503_v52 = vadd.f32 %v1499_v51, %v973_v50  ;;  %v2392_v53 = vpop.f32.mrb[7].mxu1 }
 0xca6   :  { %2520 = vtanh.f32 %v1503_v52  ;;  %v1504_v55 = vmul.f32 0.5, %v1503_v52 }
 0xca8   :  { %2522 = vtanh.f32 %v1504_v55 }
 0xcb0   :  { %v2521_v54 = vpop.eup %2520 }
 0xcb1   :  { %1511 = vrot.lane.b32.xlu0 %v2521_v54, %s2596_s18 }
 0xcb2   :  { %v2523_v56 = vpop.eup %2522 }
 0xcb3   :  { %v1506_v57 = vmul.f32 0.5, %v2523_v56 }
 0xcb5   :  { %v1507_v58 = vadd.f32 0.5, %v1506_v57 }
 0xcb7   :  { %v1509_v61 = vmul.f32 %v1507_v58, %v1412_v33 }
 0xd23   :  { %v1512_v59 = vpop.permute.xlu0 %1511 }
 0xd24   :  { %v1514_v60 = vmul.f32 %v1512_v59, %v1507_v58 }
 0xd26   :  { %1516 = vrot.lane.b32.xlu1 %v1514_v60, %s2596_s18 }
 0xd98   :  { %v1517_v62 = vpop.permute.xlu1 %1516 }
 0xd99   :  { %v1519_v63 = vadd.f32 %v1517_v62, %v1509_v61 }
 0xd9b   :  { %2524 = vtanh.f32 %v1519_v63 }
 0xda5   :  { %v2525_v0 = vpop.eup %2524 }
 0xda6   :  { %1522 = vrot.lane.b32.xlu0 %v2525_v0, %s2596_s18 }
 0xe18   :  { %v1523_v1 = vpop.permute.xlu0 %1522 }
 0xe19   :  { %v1525_v2 = vmul.f32 %v1523_v1, %v1507_v58 }
 0xe1b   :  { %v1526_v3 = vsel %vm997_vm3, %v1525_v2, 0.0  ;;  %1536 = vrot.lane.b32.xlu1 %v1525_v2, %s2597_s4 }
 0xe1c   :  { %v1527_v4 = vsel %vm1098_vm4, %v1526_v3, 0.0 }
 0xe1d   :  { %v1528_v5 = vrot.slane %v1527_v4, 4 }
 0xe1f   :  { %v1529_v6 = vadd.f32 %v1528_v5, %v1527_v4 }
 0xe21   :  { %v1530_v7 = vrot.slane %v1529_v6, 2 }
 0xe23   :  { %v1531_v8 = vadd.f32 %v1530_v7, %v1529_v6 }
 0xe25   :  { %v1532_v9 = vrot.slane %v1531_v8, 1 }
 0xe27   :  { %v1533_v10 = vadd.f32 %v1532_v9, %v1531_v8  ;;  %v988_v9 = vadd.f32 %v2811_v13, %v2756_v41  ;;  %v2236_v41 = vld [vmem:[%s2893_s5] ss:$0 sm:$0xff] }
 0xe29   :  { %v1534_v12 = vmul.f32 0.5, %v1533_v10 }
 0xe2b   :  { %v1863_v16 = vsel %vm1862_vm8, %v1861_v48, %v1534_v12 }
 0xe8d   :  { %v1537_v19 = vpop.permute.xlu1 %1536 }
 0xe8e   :  { %2402 = vmatmul.mubr.msk.f32.vlgmr.msra.gmra.mrb[10].mxu0 %vm998_vm2, %v1537_v19 }
 0xe8f   :  { %2486 = vmatpush3.bf16.msra.mxu0 %v2719_v29  ;;  %2423 = vmatprep.mubr.msk.f32.mxu0 %vm2594_vm0, %v2595_v18 }
 0xe90   :  { %2487 = vmatprep.subr.bf16.mxu0 %v2593_v17 }
 0xe93   :  { %2489 = vmatpush3.bf16.msra.mxu0 %v2729_v34 }
 0xf61   :  { %v1606_v21 = vpop.f32.mrb[10].mxu0 }
 0xf62   :  { %v1610_v22 = vadd.f32 %v1606_v21, %v978_v20  ;;  %v2403_v23 = vpop.f32.mrb[11].mxu0 }
 0xf64   :  { %2526 = vtanh.f32 %v1610_v22  ;;  %v1611_v25 = vmul.f32 0.5, %v1610_v22 }
 0xf66   :  { %2528 = vtanh.f32 %v1611_v25 }
 0xf6e   :  { %v2527_v24 = vpop.eup %2526 }
 0xf6f   :  { %1618 = vrot.lane.b32.xlu0 %v2527_v24, %s2596_s18 }
 0xf70   :  { %v2529_v29 = vpop.eup %2528 }
 0xf71   :  { %v1613_v26 = vmul.f32 0.5, %v2529_v29 }
 0xf73   :  { %v1614_v27 = vadd.f32 0.5, %v1613_v26 }
 0xf75   :  { %v1616_v17 = vmul.f32 %v1614_v27, %v1519_v63 }
 0xfe1   :  { %v1619_v18 = vpop.permute.xlu0 %1618 }
 0xfe2   :  { %v1621_v28 = vmul.f32 %v1619_v18, %v1614_v27 }
 0xfe4   :  { %1623 = vrot.lane.b32.xlu1 %v1621_v28, %s2596_s18 }
0x1056   :  { %v1624_v34 = vpop.permute.xlu1 %1623 }
0x1057   :  { %v1626_v30 = vadd.f32 %v1624_v34, %v1616_v17 }
0x1059   :  { %2530 = vtanh.f32 %v1626_v30 }
0x1063   :  { %v2531_v11 = vpop.eup %2530 }
0x1064   :  { %1629 = vrot.lane.b32.xlu0 %v2531_v11, %s2596_s18 }
0x10d6   :  { %v1630_v31 = vpop.permute.xlu0 %1629 }
0x10d7   :  { %v1632_v32 = vmul.f32 %v1630_v31, %v1614_v27 }
0x10d9   :  { %v1633_v33 = vsel %vm997_vm3, %v1632_v32, 0.0  ;;  %1643 = vrot.lane.b32.xlu1 %v1632_v32, %s2597_s4 }
0x10da   :  { %v1634_v35 = vsel %vm1098_vm4, %v1633_v33, 0.0 }
0x10db   :  { %v1635_v36 = vrot.slane %v1634_v35, 4 }
0x10dd   :  { %v1636_v37 = vadd.f32 %v1635_v36, %v1634_v35 }
0x10df   :  { %v1637_v38 = vrot.slane %v1636_v37, 2 }
0x10e1   :  { %v1638_v39 = vadd.f32 %v1637_v38, %v1636_v37 }
0x10e3   :  { %v1639_v40 = vrot.slane %v1638_v39, 1 }
0x10e5   :  { %v1640_v42 = vadd.f32 %v1639_v40, %v1638_v39 }
0x10e7   :  { %v1641_v43 = vmul.f32 0.5, %v1640_v42 }
0x10e9   :  { %v1865_v44 = vsel %vm1864_vm9, %v1863_v16, %v1641_v43 }
0x114b   :  { %v1644_v45 = vpop.permute.xlu1 %1643 }
0x114c   :  { %2413 = vmatmul.mubr.msk.f32.vlgmr.msra.gmra.mrb[8].mxu1 %vm998_vm2, %v1644_v45 }
0x121f   :  { %v1713_v47 = vpop.f32.mrb[8].mxu1 }
0x1220   :  { %v1717_v48 = vadd.f32 %v1713_v47, %v983_v46  ;;  %v2414_v49 = vpop.f32.mrb[9].mxu1 }
0x1222   :  { %2532 = vtanh.f32 %v1717_v48  ;;  %v1718_v51 = vmul.f32 0.5, %v1717_v48 }
0x1224   :  { %2534 = vtanh.f32 %v1718_v51 }
0x122c   :  { %v2533_v50 = vpop.eup %2532 }
0x122d   :  { %1725 = vrot.lane.b32.xlu0 %v2533_v50, %s2596_s18 }
0x122e   :  { %v2535_v52 = vpop.eup %2534 }
0x122f   :  { %v1720_v53 = vmul.f32 0.5, %v2535_v52 }
0x1231   :  { %v1721_v54 = vadd.f32 0.5, %v1720_v53 }
0x1233   :  { %v1723_v57 = vmul.f32 %v1721_v54, %v1626_v30 }
0x129f   :  { %v1726_v55 = vpop.permute.xlu0 %1725 }
0x12a0   :  { %v1728_v56 = vmul.f32 %v1726_v55, %v1721_v54 }
0x12a2   :  { %1730 = vrot.lane.b32.xlu1 %v1728_v56, %s2596_s18 }
0x1314   :  { %v1731_v58 = vpop.permute.xlu1 %1730 }
0x1315   :  { %v1733_v59 = vadd.f32 %v1731_v58, %v1723_v57 }
0x1317   :  { %2536 = vtanh.f32 %v1733_v59 }
0x1321   :  { %v2537_v15 = vpop.eup %2536 }
0x1322   :  { %1736 = vrot.lane.b32.xlu0 %v2537_v15, %s2596_s18 }
0x1394   :  { %v1737_v60 = vpop.permute.xlu0 %1736 }
0x1395   :  { %v1739_v61 = vmul.f32 %v1737_v60, %v1721_v54 }
0x1397   :  { %v1740_v62 = vsel %vm997_vm3, %v1739_v61, 0.0  ;;  %1750 = vrot.lane.b32.xlu1 %v1739_v61, %s2597_s4 }
0x1398   :  { %v1741_v63 = vsel %vm1098_vm4, %v1740_v62, 0.0 }
0x1399   :  { %v1742_v0 = vrot.slane %v1741_v63, 4 }
0x139b   :  { %v1743_v1 = vadd.f32 %v1742_v0, %v1741_v63 }
0x139d   :  { %v1744_v2 = vrot.slane %v1743_v1, 2 }
0x139f   :  { %v1745_v3 = vadd.f32 %v1744_v2, %v1743_v1 }
0x13a1   :  { %v1746_v4 = vrot.slane %v1745_v3, 1 }
0x13a3   :  { %v1747_v5 = vadd.f32 %v1746_v4, %v1745_v3 }
0x13a5   :  { %v1748_v6 = vmul.f32 0.5, %v1747_v5 }
0x13a7   :  { %v1867_v7 = vsel %vm1866_vm10, %v1865_v44, %v1748_v6 }
0x1409   :  { %v1751_v8 = vpop.permute.xlu1 %1750 }
0x140a   :  { %2424 = vmatmul.mubr.msk.f32.vlgmr.msra.gmra.mrb[12].mxu0 %vm998_vm2, %v1751_v8 }
0x14dd   :  { %v1820_v10 = vpop.f32.mrb[12].mxu0 }
0x14de   :  { %v1824_v12 = vadd.f32 %v1820_v10, %v988_v9  ;;  %v2425_v16 = vpop.f32.mrb[13].mxu0 }
0x14e0   :  { %2538 = vtanh.f32 %v1824_v12  ;;  %v1825_v20 = vmul.f32 0.5, %v1824_v12 }
0x14e2   :  { %2540 = vtanh.f32 %v1825_v20 }
0x14ea   :  { %v2539_v19 = vpop.eup %2538 }
0x14eb   :  { %1832 = vrot.lane.b32.xlu0 %v2539_v19, %s2596_s18 }
0x14ec   :  { %v2541_v21 = vpop.eup %2540 }
0x14ed   :  { %v1827_v22 = vmul.f32 0.5, %v2541_v21 }
0x14ef   :  { %v1828_v23 = vadd.f32 0.5, %v1827_v22 }
0x14f1   :  { %v1830_v13 = vmul.f32 %v1828_v23, %v1733_v59 }
0x155d   :  { %v1833_v24 = vpop.permute.xlu0 %1832 }
0x155e   :  { %v1835_v25 = vmul.f32 %v1833_v24, %v1828_v23 }
0x1560   :  { %1837 = vrot.lane.b32.xlu1 %v1835_v25, %s2596_s18 }
0x1564   :  { %1876 = vrot.lane.b32.xlu1 %v2236_v41, %s2597_s4 }
0x15d2   :  { %v1838_v29 = vpop.permute.xlu1 %1837 }
0x15d3   :  { %v1840_v26 = vadd.f32 %v1838_v29, %v1830_v13 }
0x15d5   :  { %2542 = vtanh.f32 %v1840_v26 }
0x15d6   :  { %v1877_v36 = vpop.permute.xlu1 %1876 }
0x15df   :  { %v2543_v27 = vpop.eup %2542 }
0x15e0   :  { %1843 = vrot.lane.b32.xlu0 %v2543_v27, %s2596_s18 }
0x1652   :  { %v1844_v18 = vpop.permute.xlu0 %1843 }
0x1653   :  { %v1846_v28 = vmul.f32 %v1844_v18, %v1828_v23 }
0x1655   :  { %v1847_v17 = vsel %vm997_vm3, %v1846_v28, 0.0 }
0x1656   :  { %v1848_v34 = vsel %vm1098_vm4, %v1847_v17, 0.0 }
0x1657   :  { %v1849_v30 = vrot.slane %v1848_v34, 4 }
0x1659   :  { %v1850_v11 = vadd.f32 %v1849_v30, %v1848_v34 }
0x165b   :  { %v1851_v31 = vrot.slane %v1850_v11, 2 }
0x165d   :  { %v1852_v32 = vadd.f32 %v1851_v31, %v1850_v11 }
0x165f   :  { %v1853_v33 = vrot.slane %v1852_v32, 1 }
0x1661   :  { %v1854_v35 = vadd.f32 %v1853_v33, %v1852_v32 }
0x1663   :  { %v1855_v37 = vmul.f32 0.5, %v1854_v35 }
0x1665   :  { %v1869_v38 = vsel %vm1868_vm11, %v1867_v7, %v1855_v37 }
0x1666   :  { %v1879_v39 = vmul.f32 %v1877_v36, %v1869_v38 }
0x1668   :  { %1881 = vrot.lane.b32.xlu0 %v1879_v39, %s2597_s4 }
0x16da   :  { %v1882_v40 = vpop.permute.xlu0 %1881 }
0x16db   :  { %v1884_v42 = vsel %vm998_vm2, %v1882_v40, 0.0 }
0x16dc   :  { %1885 = vadd.xlane.f32.xlu1 %v1884_v42 }
0x1769   :  { %v1886_v43 = vpop.xlane.xlu1 %1885 }
0x176a   :  { %v1894_v44 = vadd.f32 %v2237_v14, %v1886_v43 }
0x176c   :  { %2544 = vtanh.f32 %v1894_v44 }
0x1776   :  { %v2545_v45 = vpop.eup %2544 }
0x1777   :  { %1897 = vst.msk [vmem:[%s2895_s7] sm:$0xff] %vm1896_vm12, %v2545_v45 }
0x1778   :  { %1902 = vsyncpa [#allocation6], 1 }
0x1779   :  { %1903 = vsyncmov [#allocation3] }
0x177c   :  { %s1904_s21 = vpop.sfrf %1903 }
0x177d   :  { %p2238_p5 = scmp.ne.s32.totalorder %s1904_s21, 0 }
0x177f   :  { %1908 = shalt.err (%p2238_p5)  }
0x1780   :  { %1910 = vsyncmov [#allocation3 + $0x1] }
0x1783   :  { %s1911_s22 = vpop.sfrf %1910 }
0x1784   :  { %p2239_p6 = scmp.ne.s32.totalorder %s1911_s22, 0 }
0x1786   :  { %1915 = shalt.err (%p2239_p6)  }
0x1787   :  { %1917 = vsyncmov [#allocation3 + $0x2] }
0x178a   :  { %s1918_s23 = vpop.sfrf %1917 }
0x178b   :  { %p2240_p7 = scmp.ne.s32.totalorder %s1918_s23, 0 }
0x178d   :  { %1922 = shalt.err (%p2240_p7)  }
0x178e   :  { %1924 = vsyncmov [#allocation3 + $0x3] }
0x1791   :  { %s1925_s24 = vpop.sfrf %1924 }
0x1792   :  { %p2241_p8 = scmp.ne.s32.totalorder %s1925_s24, 0 }
0x1794   :  { %1929 = shalt.err (%p2241_p8)  }
0x1795   :  { %1931 = vsyncmov [#allocation3 + $0x4] }
0x1798   :  { %s1932_s25 = vpop.sfrf %1931 }
0x1799   :  { %p2242_p9 = scmp.ne.s32.totalorder %s1932_s25, 0 }
0x179b   :  { %1936 = shalt.err (%p2242_p9)  }
0x179c   :  { %1938 = vsyncmov [#allocation3 + $0x5] }
0x179f   :  { %s1939_s7 = vpop.sfrf %1938 }
0x17a0   :  { %p2243_p10 = scmp.ne.s32.totalorder %s1939_s7, 0 }
0x17a2   :  { %1943 = shalt.err (%p2243_p10)  }
0x17a3   :  { %1945 = vsyncmov [#allocation3 + $0x6] }
0x17a6   :  { %s1946_s26 = vpop.sfrf %1945 }
0x17a7   :  { %p2244_p11 = scmp.ne.s32.totalorder %s1946_s26, 0 }
0x17a9   :  { %1950 = shalt.err (%p2244_p11)  }
0x17aa   :  { %1952 = vsyncmov [#allocation3 + $0x7] }
0x17ad   :  { %s1953_s27 = vpop.sfrf %1952 }
0x17ae   :  { %p2245_p12 = scmp.ne.s32.totalorder %s1953_s27, 0 }
0x17b0   :  { %1957 = shalt.err (%p2245_p12)  }
0x17b1   :  { %1959 = vsyncmov [#allocation3 + $0x8] }
0x17b4   :  { %s1960_s28 = vpop.sfrf %1959 }
0x17b5   :  { %p2246_p13 = scmp.ne.s32.totalorder %s1960_s28, 0 }
0x17b7   :  { %1964 = shalt.err (%p2246_p13)  }
0x17b8   :  { %1966 = vsyncmov [#allocation3 + $0x9] }
0x17bb   :  { %s1967_s29 = vpop.sfrf %1966 }
0x17bc   :  { %p2247_p0 = scmp.ne.s32.totalorder %s1967_s29, 0 }
0x17be   :  { %1971 = shalt.err (%p2247_p0)  }
0x17bf   :  { %1973 = vsyncmov [#allocation3 + $0xa] }
0x17c2   :  { %s1974_s30 = vpop.sfrf %1973 }
0x17c3   :  { %p2248_p1 = scmp.ne.s32.totalorder %s1974_s30, 0 }
0x17c5   :  { %1978 = shalt.err (%p2248_p1)  }
0x17c6   :  { %1980 = vsyncmov [#allocation3 + $0xb] }
0x17c9   :  { %s1981_s6 = vpop.sfrf %1980 }
0x17ca   :  { %p2249_p2 = scmp.ne.s32.totalorder %s1981_s6, 0 }
0x17cc   :  { %1985 = shalt.err (%p2249_p2)  }
0x17cd   :  { %1987 = vsyncmov [#allocation3 + $0xc] }
0x17d0   :  { %s1988_s8 = vpop.sfrf %1987 }
0x17d1   :  { %p2250_p3 = scmp.ne.s32.totalorder %s1988_s8, 0 }
0x17d3   :  { %1992 = shalt.err (%p2250_p3)  }
0x17d4   :  { %1994 = vsyncmov [#allocation3 + $0xd] }
0x17d7   :  { %s1995_s9 = vpop.sfrf %1994 }
0x17d8   :  { %p2251_p4 = scmp.ne.s32.totalorder %s1995_s9, 0 }
0x17da   :  { %1999 = shalt.err (%p2251_p4)  }
0x17db   :  { %2001 = vsyncmov [#allocation3 + $0xe] }
0x17de   :  { %s2002_s10 = vpop.sfrf %2001 }
0x17df   :  { %p2252_p5 = scmp.ne.s32.totalorder %s2002_s10, 0 }
0x17e1   :  { %2006 = shalt.err (%p2252_p5)  }
0x17e2   :  { %2008 = vsyncmov [#allocation3 + $0xf] }
0x17e5   :  { %s2009_s0 = vpop.sfrf %2008 }
0x17e6   :  { %p2253_p6 = scmp.ne.s32.totalorder %s2009_s0, 0 }
0x17e8   :  { %2013 = shalt.err (%p2253_p6)  }

</bundles_post_ra>
